<compile_context>
chip_gen: v7x
topology: tpu7x:2x2x1
jax: 0.10.0
libtpu: 0.0.40
codegen_flags: <defaults>
</compile_context>

<pallas_src>
import jax
import jax.numpy as jnp
from jax import lax
from jax.experimental import pallas as pl
from jax.experimental.pallas import tpu as pltpu

# ---- small, deterministic config (mirrors the PyTorch module's __init__) ----
N_VOCAB = 50
EMBED = 32
HIDDEN = 32
NUM_LAYERS = 2
NUM_CLASSES = 4
BATCH = 2
SEQ = 8

VMEM_SPEC = pl.BlockSpec(memory_space=pltpu.MemorySpace.VMEM)


# ---------------------------------------------------------------------------
# Single fused Pallas kernel: embedding -> fused bi-LSTM stack -> FC.
# PyTorch gate order per direction (i, f, g, o);  c = f*c + i*g;  h = o*tanh(c)
# Fused gate column layout: [i_f,i_b,f_f,f_b,g_f,g_b,o_f,o_b], each H wide.
# Carry layout: h, c = [B, 2H] with fwd half in [:, :H], bwd half in [:, H:].
# ---------------------------------------------------------------------------
def _textrnn_kernel(tok_ref, emb_ref, *refs):
    """
    tok_ref : [T*B, 1] int32, time-major flattened token ids (row = t*B + b)
    emb_ref : [V_pad, E] f32 embedding table (zero-padded vocab rows, V_pad=128)
    refs    : per layer (m1, m2, b_cat, w_hh_block), then (fc_w1, fc_w2, fc_b),
              then the single [B, C] output ref.
    """
    out_ref = refs[-1]
    fc_w1_ref, fc_w2_ref, fc_b_ref = refs[-4], refs[-3], refs[-2]
    layer_refs = refs[:-4]
    num_layers = len(layer_refs) // 4

    B = out_ref.shape[0]
    TB = tok_ref.shape[0]
    T = TB // B
    V = emb_ref.shape[0]
    H8 = layer_refs[3].shape[1]          # w_hh_block: [2H, 8H]
    H2 = H8 // 4                         # 2H

    # ---- embedding gather as a one-hot matmul (exact: padded rows are 0) ----
    tok = tok_ref[...]                                          # [T*B, 1] i32
    vocab_ids = lax.broadcasted_iota(jnp.int32, (TB, V), 1)     # [T*B, 128]
    onehot = (vocab_ids == tok).astype(jnp.float32)             # [T*B, 128]
    X = jnp.dot(onehot, emb_ref[...],
                preferred_element_type=jnp.float32)             # [T*B, E]

    h_for_fwd_tail = None   # h at fused step T-1 (fwd half = h_f at t=T-1)
    h_for_bwd_head = None   # h at fused step 0   (bwd half = h_b at t=T-1)

    for layer in range(num_layers):
        m1_ref, m2_ref, b_ref, whh_ref = layer_refs[4 * layer:4 * layer + 4]

        # Hoisted input projections (both directions, both time orders).
        # G1[s] holds fwd-direction gate inputs for time s (bwd cols are 0),
        # G2[t] holds bwd-direction gate inputs for time t (fwd cols are 0).
        G1 = jnp.dot(X, m1_ref[...],
                     preferred_element_type=jnp.float32) + b_ref[...]
        G2 = jnp.dot(X, m2_ref[...],
                     preferred_element_type=jnp.float32)

        # Per-fused-step gate inputs: fwd time s paired with bwd time T-1-s.
        # Entirely h-independent -> off the serial critical path.
        g_in = [G1[s * B:(s + 1) * B, :] + G2[(T - 1 - s) * B:(T - s) * B, :]
                for s in range(T)]

        whh = whh_ref[...]                                      # [2H, 8H]
        h = jnp.zeros((B, H2), jnp.float32)
        c = jnp.zeros((B, H2), jnp.float32)
        h_steps = []
        for s in range(T):                                      # fully unrolled
            gates = g_in[s] + jnp.dot(h, whh,
                                      preferred_element_type=jnp.float32)
            sig = jax.nn.sigmoid(gates)      # one full-width EUP pass [B, 8H]
            tnh = jnp.tanh(gates)            # one full-width EUP pass [B, 8H]
            i_all = sig[:, 0 * H2:1 * H2]    # both directions, contiguous
            f_all = sig[:, 1 * H2:2 * H2]
            g_all = tnh[:, 2 * H2:3 * H2]
            o_all = sig[:, 3 * H2:4 * H2]
            c = f_all * c + i_all * g_all
            h = o_all * jnp.tanh(c)
            h_steps.append(h)

        if layer < num_layers - 1:
            # Next layer consumes the fused-step-major stack directly; its
            # placed M1/M2 matrices encode the [hf|hb] split + time reversal.
            X = jnp.concatenate(h_steps, axis=0)                # [T*B, 2H]
        else:
            h_for_fwd_tail = h_steps[T - 1]
            h_for_bwd_head = h_steps[0]

    # FC head on out[:, -1, :] = [h_fwd(T-1) | h_bwd(T-1)] via row-placed fc_w.
    out_ref[...] = (jnp.dot(h_for_fwd_tail, fc_w1_ref[...],
                            preferred_element_type=jnp.float32)
                    + jnp.dot(h_for_bwd_head, fc_w2_ref[...],
                              preferred_element_type=jnp.float32)
                    + fc_b_ref[...])


# ---------------------------------------------------------------------------
# Wrapper: weight layout plumbing (done once, under jit) + one pallas_call.
# ---------------------------------------------------------------------------
def _place_gates(w4, direction):
    """[d, 4H] (gate order i,f,g,o) -> [d, 8H] with gate chunks placed in the
    interleaved fwd/bwd column layout; the other direction's columns are 0."""
    d, h4 = w4.shape
    h = h4 // 4
    z = jnp.zeros((d, h), w4.dtype)
    cols = []
    for g in range(4):
        wg = w4[:, g * h:(g + 1) * h]
        cols += ([wg, z] if direction == "fwd" else [z, wg])
    return jnp.concatenate(cols, axis=1)


def textrnn_forward(tokens, params):
    """tokens: [B, T] int32  ->  logits [B, num_classes] float32."""
    B, T = tokens.shape
    H = params["lstm"][0]["fwd"][1].shape[0]
    num_classes = params["fc_w"].shape[1]

    # Time-major flatten of the ids; pad vocab to 128 lanes (rows stay zero).
    tok_tm = jnp.transpose(tokens, (1, 0)).reshape(T * B, 1).astype(jnp.int32)
    v = params["embedding"].shape[0]
    v_pad = ((v + 127) // 128) * 128
    emb = jnp.pad(params["embedding"], ((0, v_pad - v), (0, 0)))

    flat = [tok_tm, emb]
    for li, layer in enumerate(params["lstm"]):
        w_ih_f, w_hh_f, b_f = layer["fwd"]
        w_ih_b, w_hh_b, b_b = layer["bwd"]
        if li == 0:
            # Layer-0 input is x[t]; M1 feeds fwd columns, M2 feeds bwd columns.
            m1 = _place_gates(w_ih_f, "fwd")                    # [E, 8H]
            m2 = _place_gates(w_ih_b, "bwd")                    # [E, 8H]
        else:
            # Layer >0 input is the fused-step-major h stack [hf[s] | hb[T-1-s]].
            # g_in[s] = Hstack[s] @ M1 + Hstack[T-1-s] @ M2 + b.
            m1 = jnp.concatenate([_place_gates(w_ih_f[:H], "fwd"),
                                  _place_gates(w_ih_b[H:], "bwd")], axis=0)
            m2 = jnp.concatenate([_place_gates(w_ih_b[:H], "bwd"),
                                  _place_gates(w_ih_f[H:], "fwd")], axis=0)
        b_cat = _place_gates(b_f, "fwd") + _place_gates(b_b, "bwd")   # [1, 8H]
        whh = jnp.concatenate([_place_gates(w_hh_f, "fwd"),
                               _place_gates(w_hh_b, "bwd")], axis=0)  # [2H, 8H]
        flat.extend([m1, m2, b_cat, whh])

    zc = jnp.zeros((H, num_classes), jnp.float32)
    fc_w1 = jnp.concatenate([params["fc_w"][:H], zc], axis=0)   # [2H, C]
    fc_w2 = jnp.concatenate([zc, params["fc_w"][H:]], axis=0)   # [2H, C]
    flat.extend([fc_w1, fc_w2, params["fc_b"]])

    return pl.pallas_call(
        _textrnn_kernel,
        out_shape=jax.ShapeDtypeStruct((B, num_classes), jnp.float32),
        in_specs=[VMEM_SPEC] * len(flat),
        out_specs=VMEM_SPEC,
    )(*flat)


# ---------------------------------------------------------------------------
# Pure-JAX reference (for correctness check only) — uses the raw per-direction
# parameters, so it also validates the wrapper's weight-placement plumbing.
# ---------------------------------------------------------------------------
def _lstm_cell_ref(x_t, h, c, w_ih, w_hh, b):
    hh = h.shape[-1]
    g = (jnp.dot(x_t, w_ih, precision=lax.Precision.HIGHEST)
         + jnp.dot(h, w_hh, precision=lax.Precision.HIGHEST) + b)
    i = jax.nn.sigmoid(g[:, 0 * hh:1 * hh])
    f = jax.nn.sigmoid(g[:, 1 * hh:2 * hh])
    gg = jnp.tanh(g[:, 2 * hh:3 * hh])
    o = jax.nn.sigmoid(g[:, 3 * hh:4 * hh])
    c = f * c + i * gg
    h = o * jnp.tanh(c)
    return h, c


def textrnn_reference(tokens, params):
    out = jnp.take(params["embedding"], tokens, axis=0)          # [B, T, E]
    B, T, _ = out.shape
    H = params["lstm"][0]["fwd"][1].shape[0]
    for layer in params["lstm"]:
        hs_f = []
        h = jnp.zeros((B, H), jnp.float32)
        c = jnp.zeros((B, H), jnp.float32)
        for t in range(T):
            h, c = _lstm_cell_ref(out[:, t, :], h, c, *layer["fwd"])
            hs_f.append(h)
        hs_b = [None] * T
        h = jnp.zeros((B, H), jnp.float32)
        c = jnp.zeros((B, H), jnp.float32)
        for t in range(T - 1, -1, -1):
            h, c = _lstm_cell_ref(out[:, t, :], h, c, *layer["bwd"])
            hs_b[t] = h
        out = jnp.stack(
            [jnp.concatenate([hs_f[t], hs_b[t]], axis=-1) for t in range(T)],
            axis=1)                                              # [B, T, 2H]
    last = out[:, -1, :]
    return (jnp.dot(last, params["fc_w"], precision=lax.Precision.HIGHEST)
            + params["fc_b"])


# ---------------------------------------------------------------------------
# Deterministic parameter init (same shapes as the PyTorch module).
# NOTE: b is the combined bias (b_ih + b_hh of nn.LSTM) — sum them if porting
#       trained PyTorch weights.
# ---------------------------------------------------------------------------
def init_params(key):
    keys = jax.random.split(key, 3 + NUM_LAYERS * 2 * 3)
    ki = iter(keys)

    emb = 0.1 * jax.random.normal(next(ki), (N_VOCAB, EMBED), jnp.float32)
    emb = emb.at[N_VOCAB - 1].set(0.0)                           # padding_idx row

    scale = 1.0 / jnp.sqrt(HIDDEN)
    lstm_layers = []
    for l in range(NUM_LAYERS):
        d_in = EMBED if l == 0 else 2 * HIDDEN
        layer = {}
        for direction in ("fwd", "bwd"):
            w_ih = scale * jax.random.normal(next(ki), (d_in, 4 * HIDDEN), jnp.float32)
            w_hh = scale * jax.random.normal(next(ki), (HIDDEN, 4 * HIDDEN), jnp.float32)
            b = scale * jax.random.normal(next(ki), (1, 4 * HIDDEN), jnp.float32)
            layer[direction] = (w_ih, w_hh, b)
        lstm_layers.append(layer)

    fc_w = scale * jax.random.normal(next(ki), (2 * HIDDEN, NUM_CLASSES), jnp.float32)
    fc_b = scale * jax.random.normal(next(ki), (1, NUM_CLASSES), jnp.float32)

    return {"embedding": emb, "lstm": lstm_layers, "fc_w": fc_w, "fc_b": fc_b}


if __name__ == "__main__":
    key = jax.random.PRNGKey(0)
    k_par, k_tok = jax.random.split(key)
    params = init_params(k_par)

    tokens = jax.random.randint(k_tok, (BATCH, SEQ), 0, N_VOCAB, dtype=jnp.int32)

    logits = jax.jit(textrnn_forward)(tokens, params)
    jax.block_until_ready(logits)

    assert logits.shape == (BATCH, NUM_CLASSES)
    assert logits.dtype == jnp.float32

    ref = jax.jit(textrnn_reference)(tokens, params)
    jax.block_until_ready(ref)
    max_diff = jnp.max(jnp.abs(logits - ref))
    assert jnp.allclose(logits, ref, atol=2e-3, rtol=2e-3), f"max diff {max_diff}"

    print("KERNEL_OK")
</pallas_src>

<mosaic_0001>
module attributes {stable_mosaic.version = 11 : i64} {
  func.func @_textrnn_kernel(%arg0: memref<16x1xi32, #tpu.memory_space<vmem>>, %arg1: memref<128x32xf32, #tpu.memory_space<vmem>>, %arg2: memref<32x256xf32, #tpu.memory_space<vmem>>, %arg3: memref<32x256xf32, #tpu.memory_space<vmem>>, %arg4: memref<1x256xf32, #tpu.memory_space<vmem>>, %arg5: memref<64x256xf32, #tpu.memory_space<vmem>>, %arg6: memref<64x256xf32, #tpu.memory_space<vmem>>, %arg7: memref<64x256xf32, #tpu.memory_space<vmem>>, %arg8: memref<1x256xf32, #tpu.memory_space<vmem>>, %arg9: memref<64x256xf32, #tpu.memory_space<vmem>>, %arg10: memref<64x4xf32, #tpu.memory_space<vmem>>, %arg11: memref<64x4xf32, #tpu.memory_space<vmem>>, %arg12: memref<1x4xf32, #tpu.memory_space<vmem>>, %arg13: memref<2x4xf32, #tpu.memory_space<vmem>>) attributes {dimension_semantics = [], scalar_prefetch = 0 : i64, scratch_operands = 0 : i64, tpu.core_type = #tpu.core_type<tc>} {
    %c0 = arith.constant 0 : index
    %c0_0 = arith.constant 0 : index
    %0 = vector.load %arg0[%c0, %c0_0] : memref<16x1xi32, #tpu.memory_space<vmem>>, vector<16x1xi32>
    %1 = tpu.iota {dimensions = array<i32: 1>} : vector<16x128xi32>
    %2 = vector.broadcast %0 : vector<16x1xi32> to vector<16x128xi32>
    %3 = arith.cmpi eq, %1, %2 : vector<16x128xi32>
    %4 = arith.extui %3 : vector<16x128xi1> to vector<16x128xi32>
    %5 = arith.sitofp %4 : vector<16x128xi32> to vector<16x128xf32>
    %c0_1 = arith.constant 0 : index
    %c0_2 = arith.constant 0 : index
    %6 = vector.load %arg1[%c0_1, %c0_2] : memref<128x32xf32, #tpu.memory_space<vmem>>, vector<128x32xf32>
    %cst = arith.constant dense<0.000000e+00> : vector<16x32xf32>
    %7 = tpu.matmul %5, %6, %cst {dimension_numbers = #tpu.dot_dimension_numbers<[1], [0], [0], [1], [0, 0, 1, 1], [], []>} : vector<16x128xf32>, vector<128x32xf32>, vector<16x32xf32> -> vector<16x32xf32>
    %c0_3 = arith.constant 0 : index
    %c0_4 = arith.constant 0 : index
    %8 = vector.load %arg2[%c0_3, %c0_4] : memref<32x256xf32, #tpu.memory_space<vmem>>, vector<32x256xf32>
    %cst_5 = arith.constant dense<0.000000e+00> : vector<16x256xf32>
    %9 = tpu.matmul %7, %8, %cst_5 {dimension_numbers = #tpu.dot_dimension_numbers<[1], [0], [0], [1], [0, 0, 1, 1], [], []>} : vector<16x32xf32>, vector<32x256xf32>, vector<16x256xf32> -> vector<16x256xf32>
    %c0_6 = arith.constant 0 : index
    %c0_7 = arith.constant 0 : index
    %10 = vector.load %arg4[%c0_6, %c0_7] : memref<1x256xf32, #tpu.memory_space<vmem>>, vector<1x256xf32>
    %11 = vector.broadcast %10 : vector<1x256xf32> to vector<16x256xf32>
    %12 = arith.addf %9, %11 : vector<16x256xf32>
    %c0_8 = arith.constant 0 : index
    %c0_9 = arith.constant 0 : index
    %13 = vector.load %arg3[%c0_8, %c0_9] : memref<32x256xf32, #tpu.memory_space<vmem>>, vector<32x256xf32>
    %cst_10 = arith.constant dense<0.000000e+00> : vector<16x256xf32>
    %14 = tpu.matmul %7, %13, %cst_10 {dimension_numbers = #tpu.dot_dimension_numbers<[1], [0], [0], [1], [0, 0, 1, 1], [], []>} : vector<16x32xf32>, vector<32x256xf32>, vector<16x256xf32> -> vector<16x256xf32>
    %15 = vector.extract_strided_slice %12 {offsets = [0, 0], sizes = [2, 256], strides = [1, 1]} : vector<16x256xf32> to vector<2x256xf32>
    %16 = vector.extract_strided_slice %14 {offsets = [14, 0], sizes = [2, 256], strides = [1, 1]} : vector<16x256xf32> to vector<2x256xf32>
    %17 = arith.addf %15, %16 : vector<2x256xf32>
    %18 = vector.extract_strided_slice %12 {offsets = [2, 0], sizes = [2, 256], strides = [1, 1]} : vector<16x256xf32> to vector<2x256xf32>
    %19 = vector.extract_strided_slice %14 {offsets = [12, 0], sizes = [2, 256], strides = [1, 1]} : vector<16x256xf32> to vector<2x256xf32>
    %20 = arith.addf %18, %19 : vector<2x256xf32>
    %21 = vector.extract_strided_slice %12 {offsets = [4, 0], sizes = [2, 256], strides = [1, 1]} : vector<16x256xf32> to vector<2x256xf32>
    %22 = vector.extract_strided_slice %14 {offsets = [10, 0], sizes = [2, 256], strides = [1, 1]} : vector<16x256xf32> to vector<2x256xf32>
    %23 = arith.addf %21, %22 : vector<2x256xf32>
    %24 = vector.extract_strided_slice %12 {offsets = [6, 0], sizes = [2, 256], strides = [1, 1]} : vector<16x256xf32> to vector<2x256xf32>
    %25 = vector.extract_strided_slice %14 {offsets = [8, 0], sizes = [2, 256], strides = [1, 1]} : vector<16x256xf32> to vector<2x256xf32>
    %26 = arith.addf %24, %25 : vector<2x256xf32>
    %27 = vector.extract_strided_slice %12 {offsets = [8, 0], sizes = [2, 256], strides = [1, 1]} : vector<16x256xf32> to vector<2x256xf32>
    %28 = vector.extract_strided_slice %14 {offsets = [6, 0], sizes = [2, 256], strides = [1, 1]} : vector<16x256xf32> to vector<2x256xf32>
    %29 = arith.addf %27, %28 : vector<2x256xf32>
    %30 = vector.extract_strided_slice %12 {offsets = [10, 0], sizes = [2, 256], strides = [1, 1]} : vector<16x256xf32> to vector<2x256xf32>
    %31 = vector.extract_strided_slice %14 {offsets = [4, 0], sizes = [2, 256], strides = [1, 1]} : vector<16x256xf32> to vector<2x256xf32>
    %32 = arith.addf %30, %31 : vector<2x256xf32>
    %33 = vector.extract_strided_slice %12 {offsets = [12, 0], sizes = [2, 256], strides = [1, 1]} : vector<16x256xf32> to vector<2x256xf32>
    %34 = vector.extract_strided_slice %14 {offsets = [2, 0], sizes = [2, 256], strides = [1, 1]} : vector<16x256xf32> to vector<2x256xf32>
    %35 = arith.addf %33, %34 : vector<2x256xf32>
    %36 = vector.extract_strided_slice %12 {offsets = [14, 0], sizes = [2, 256], strides = [1, 1]} : vector<16x256xf32> to vector<2x256xf32>
    %37 = vector.extract_strided_slice %14 {offsets = [0, 0], sizes = [2, 256], strides = [1, 1]} : vector<16x256xf32> to vector<2x256xf32>
    %38 = arith.addf %36, %37 : vector<2x256xf32>
    %c0_11 = arith.constant 0 : index
    %c0_12 = arith.constant 0 : index
    %39 = vector.load %arg5[%c0_11, %c0_12] : memref<64x256xf32, #tpu.memory_space<vmem>>, vector<64x256xf32>
    %cst_13 = arith.constant 0.000000e+00 : f32
    %40 = vector.broadcast %cst_13 : f32 to vector<2x64xf32>
    %cst_14 = arith.constant 0.000000e+00 : f32
    %41 = vector.broadcast %cst_14 : f32 to vector<2x64xf32>
    %cst_15 = arith.constant dense<0.000000e+00> : vector<2x256xf32>
    %42 = tpu.matmul %40, %39, %cst_15 {dimension_numbers = #tpu.dot_dimension_numbers<[1], [0], [0], [1], [0, 0, 1, 1], [], []>} : vector<2x64xf32>, vector<64x256xf32>, vector<2x256xf32> -> vector<2x256xf32>
    %43 = arith.addf %17, %42 : vector<2x256xf32>
    %44 = arith.negf %43 : vector<2x256xf32>
    %45 = math.exp %44 : vector<2x256xf32>
    %cst_16 = arith.constant 1.000000e+00 : f32
    %46 = vector.broadcast %cst_16 : f32 to vector<2x256xf32>
    %47 = arith.addf %46, %45 : vector<2x256xf32>
    %48 = arith.divf %46, %47 : vector<2x256xf32>
    %49 = math.tanh %43 : vector<2x256xf32>
    %50 = vector.extract_strided_slice %48 {offsets = [0, 0], sizes = [2, 64], strides = [1, 1]} : vector<2x256xf32> to vector<2x64xf32>
    %51 = vector.extract_strided_slice %48 {offsets = [0, 64], sizes = [2, 64], strides = [1, 1]} : vector<2x256xf32> to vector<2x64xf32>
    %52 = vector.extract_strided_slice %49 {offsets = [0, 128], sizes = [2, 64], strides = [1, 1]} : vector<2x256xf32> to vector<2x64xf32>
    %53 = vector.extract_strided_slice %48 {offsets = [0, 192], sizes = [2, 64], strides = [1, 1]} : vector<2x256xf32> to vector<2x64xf32>
    %54 = arith.mulf %51, %41 : vector<2x64xf32>
    %55 = arith.mulf %50, %52 : vector<2x64xf32>
    %56 = arith.addf %54, %55 : vector<2x64xf32>
    %57 = math.tanh %56 : vector<2x64xf32>
    %58 = arith.mulf %53, %57 : vector<2x64xf32>
    %cst_17 = arith.constant dense<0.000000e+00> : vector<2x256xf32>
    %59 = tpu.matmul %58, %39, %cst_17 {dimension_numbers = #tpu.dot_dimension_numbers<[1], [0], [0], [1], [0, 0, 1, 1], [], []>} : vector<2x64xf32>, vector<64x256xf32>, vector<2x256xf32> -> vector<2x256xf32>
    %60 = arith.addf %20, %59 : vector<2x256xf32>
    %61 = arith.negf %60 : vector<2x256xf32>
    %62 = math.exp %61 : vector<2x256xf32>
    %cst_18 = arith.constant 1.000000e+00 : f32
    %63 = vector.broadcast %cst_18 : f32 to vector<2x256xf32>
    %64 = arith.addf %63, %62 : vector<2x256xf32>
    %65 = arith.divf %63, %64 : vector<2x256xf32>
    %66 = math.tanh %60 : vector<2x256xf32>
    %67 = vector.extract_strided_slice %65 {offsets = [0, 0], sizes = [2, 64], strides = [1, 1]} : vector<2x256xf32> to vector<2x64xf32>
    %68 = vector.extract_strided_slice %65 {offsets = [0, 64], sizes = [2, 64], strides = [1, 1]} : vector<2x256xf32> to vector<2x64xf32>
    %69 = vector.extract_strided_slice %66 {offsets = [0, 128], sizes = [2, 64], strides = [1, 1]} : vector<2x256xf32> to vector<2x64xf32>
    %70 = vector.extract_strided_slice %65 {offsets = [0, 192], sizes = [2, 64], strides = [1, 1]} : vector<2x256xf32> to vector<2x64xf32>
    %71 = arith.mulf %68, %56 : vector<2x64xf32>
    %72 = arith.mulf %67, %69 : vector<2x64xf32>
    %73 = arith.addf %71, %72 : vector<2x64xf32>
    %74 = math.tanh %73 : vector<2x64xf32>
    %75 = arith.mulf %70, %74 : vector<2x64xf32>
    %cst_19 = arith.constant dense<0.000000e+00> : vector<2x256xf32>
    %76 = tpu.matmul %75, %39, %cst_19 {dimension_numbers = #tpu.dot_dimension_numbers<[1], [0], [0], [1], [0, 0, 1, 1], [], []>} : vector<2x64xf32>, vector<64x256xf32>, vector<2x256xf32> -> vector<2x256xf32>
    %77 = arith.addf %23, %76 : vector<2x256xf32>
    %78 = arith.negf %77 : vector<2x256xf32>
    %79 = math.exp %78 : vector<2x256xf32>
    %cst_20 = arith.constant 1.000000e+00 : f32
    %80 = vector.broadcast %cst_20 : f32 to vector<2x256xf32>
    %81 = arith.addf %80, %79 : vector<2x256xf32>
    %82 = arith.divf %80, %81 : vector<2x256xf32>
    %83 = math.tanh %77 : vector<2x256xf32>
    %84 = vector.extract_strided_slice %82 {offsets = [0, 0], sizes = [2, 64], strides = [1, 1]} : vector<2x256xf32> to vector<2x64xf32>
    %85 = vector.extract_strided_slice %82 {offsets = [0, 64], sizes = [2, 64], strides = [1, 1]} : vector<2x256xf32> to vector<2x64xf32>
    %86 = vector.extract_strided_slice %83 {offsets = [0, 128], sizes = [2, 64], strides = [1, 1]} : vector<2x256xf32> to vector<2x64xf32>
    %87 = vector.extract_strided_slice %82 {offsets = [0, 192], sizes = [2, 64], strides = [1, 1]} : vector<2x256xf32> to vector<2x64xf32>
    %88 = arith.mulf %85, %73 : vector<2x64xf32>
    %89 = arith.mulf %84, %86 : vector<2x64xf32>
    %90 = arith.addf %88, %89 : vector<2x64xf32>
    %91 = math.tanh %90 : vector<2x64xf32>
    %92 = arith.mulf %87, %91 : vector<2x64xf32>
    %cst_21 = arith.constant dense<0.000000e+00> : vector<2x256xf32>
    %93 = tpu.matmul %92, %39, %cst_21 {dimension_numbers = #tpu.dot_dimension_numbers<[1], [0], [0], [1], [0, 0, 1, 1], [], []>} : vector<2x64xf32>, vector<64x256xf32>, vector<2x256xf32> -> vector<2x256xf32>
    %94 = arith.addf %26, %93 : vector<2x256xf32>
    %95 = arith.negf %94 : vector<2x256xf32>
    %96 = math.exp %95 : vector<2x256xf32>
    %cst_22 = arith.constant 1.000000e+00 : f32
    %97 = vector.broadcast %cst_22 : f32 to vector<2x256xf32>
    %98 = arith.addf %97, %96 : vector<2x256xf32>
    %99 = arith.divf %97, %98 : vector<2x256xf32>
    %100 = math.tanh %94 : vector<2x256xf32>
    %101 = vector.extract_strided_slice %99 {offsets = [0, 0], sizes = [2, 64], strides = [1, 1]} : vector<2x256xf32> to vector<2x64xf32>
    %102 = vector.extract_strided_slice %99 {offsets = [0, 64], sizes = [2, 64], strides = [1, 1]} : vector<2x256xf32> to vector<2x64xf32>
    %103 = vector.extract_strided_slice %100 {offsets = [0, 128], sizes = [2, 64], strides = [1, 1]} : vector<2x256xf32> to vector<2x64xf32>
    %104 = vector.extract_strided_slice %99 {offsets = [0, 192], sizes = [2, 64], strides = [1, 1]} : vector<2x256xf32> to vector<2x64xf32>
    %105 = arith.mulf %102, %90 : vector<2x64xf32>
    %106 = arith.mulf %101, %103 : vector<2x64xf32>
    %107 = arith.addf %105, %106 : vector<2x64xf32>
    %108 = math.tanh %107 : vector<2x64xf32>
    %109 = arith.mulf %104, %108 : vector<2x64xf32>
    %cst_23 = arith.constant dense<0.000000e+00> : vector<2x256xf32>
    %110 = tpu.matmul %109, %39, %cst_23 {dimension_numbers = #tpu.dot_dimension_numbers<[1], [0], [0], [1], [0, 0, 1, 1], [], []>} : vector<2x64xf32>, vector<64x256xf32>, vector<2x256xf32> -> vector<2x256xf32>
    %111 = arith.addf %29, %110 : vector<2x256xf32>
    %112 = arith.negf %111 : vector<2x256xf32>
    %113 = math.exp %112 : vector<2x256xf32>
    %cst_24 = arith.constant 1.000000e+00 : f32
    %114 = vector.broadcast %cst_24 : f32 to vector<2x256xf32>
    %115 = arith.addf %114, %113 : vector<2x256xf32>
    %116 = arith.divf %114, %115 : vector<2x256xf32>
    %117 = math.tanh %111 : vector<2x256xf32>
    %118 = vector.extract_strided_slice %116 {offsets = [0, 0], sizes = [2, 64], strides = [1, 1]} : vector<2x256xf32> to vector<2x64xf32>
    %119 = vector.extract_strided_slice %116 {offsets = [0, 64], sizes = [2, 64], strides = [1, 1]} : vector<2x256xf32> to vector<2x64xf32>
    %120 = vector.extract_strided_slice %117 {offsets = [0, 128], sizes = [2, 64], strides = [1, 1]} : vector<2x256xf32> to vector<2x64xf32>
    %121 = vector.extract_strided_slice %116 {offsets = [0, 192], sizes = [2, 64], strides = [1, 1]} : vector<2x256xf32> to vector<2x64xf32>
    %122 = arith.mulf %119, %107 : vector<2x64xf32>
    %123 = arith.mulf %118, %120 : vector<2x64xf32>
    %124 = arith.addf %122, %123 : vector<2x64xf32>
    %125 = math.tanh %124 : vector<2x64xf32>
    %126 = arith.mulf %121, %125 : vector<2x64xf32>
    %cst_25 = arith.constant dense<0.000000e+00> : vector<2x256xf32>
    %127 = tpu.matmul %126, %39, %cst_25 {dimension_numbers = #tpu.dot_dimension_numbers<[1], [0], [0], [1], [0, 0, 1, 1], [], []>} : vector<2x64xf32>, vector<64x256xf32>, vector<2x256xf32> -> vector<2x256xf32>
    %128 = arith.addf %32, %127 : vector<2x256xf32>
    %129 = arith.negf %128 : vector<2x256xf32>
    %130 = math.exp %129 : vector<2x256xf32>
    %cst_26 = arith.constant 1.000000e+00 : f32
    %131 = vector.broadcast %cst_26 : f32 to vector<2x256xf32>
    %132 = arith.addf %131, %130 : vector<2x256xf32>
    %133 = arith.divf %131, %132 : vector<2x256xf32>
    %134 = math.tanh %128 : vector<2x256xf32>
    %135 = vector.extract_strided_slice %133 {offsets = [0, 0], sizes = [2, 64], strides = [1, 1]} : vector<2x256xf32> to vector<2x64xf32>
    %136 = vector.extract_strided_slice %133 {offsets = [0, 64], sizes = [2, 64], strides = [1, 1]} : vector<2x256xf32> to vector<2x64xf32>
    %137 = vector.extract_strided_slice %134 {offsets = [0, 128], sizes = [2, 64], strides = [1, 1]} : vector<2x256xf32> to vector<2x64xf32>
    %138 = vector.extract_strided_slice %133 {offsets = [0, 192], sizes = [2, 64], strides = [1, 1]} : vector<2x256xf32> to vector<2x64xf32>
    %139 = arith.mulf %136, %124 : vector<2x64xf32>
    %140 = arith.mulf %135, %137 : vector<2x64xf32>
    %141 = arith.addf %139, %140 : vector<2x64xf32>
    %142 = math.tanh %141 : vector<2x64xf32>
    %143 = arith.mulf %138, %142 : vector<2x64xf32>
    %cst_27 = arith.constant dense<0.000000e+00> : vector<2x256xf32>
    %144 = tpu.matmul %143, %39, %cst_27 {dimension_numbers = #tpu.dot_dimension_numbers<[1], [0], [0], [1], [0, 0, 1, 1], [], []>} : vector<2x64xf32>, vector<64x256xf32>, vector<2x256xf32> -> vector<2x256xf32>
    %145 = arith.addf %35, %144 : vector<2x256xf32>
    %146 = arith.negf %145 : vector<2x256xf32>
    %147 = math.exp %146 : vector<2x256xf32>
    %cst_28 = arith.constant 1.000000e+00 : f32
    %148 = vector.broadcast %cst_28 : f32 to vector<2x256xf32>
    %149 = arith.addf %148, %147 : vector<2x256xf32>
    %150 = arith.divf %148, %149 : vector<2x256xf32>
    %151 = math.tanh %145 : vector<2x256xf32>
    %152 = vector.extract_strided_slice %150 {offsets = [0, 0], sizes = [2, 64], strides = [1, 1]} : vector<2x256xf32> to vector<2x64xf32>
    %153 = vector.extract_strided_slice %150 {offsets = [0, 64], sizes = [2, 64], strides = [1, 1]} : vector<2x256xf32> to vector<2x64xf32>
    %154 = vector.extract_strided_slice %151 {offsets = [0, 128], sizes = [2, 64], strides = [1, 1]} : vector<2x256xf32> to vector<2x64xf32>
    %155 = vector.extract_strided_slice %150 {offsets = [0, 192], sizes = [2, 64], strides = [1, 1]} : vector<2x256xf32> to vector<2x64xf32>
    %156 = arith.mulf %153, %141 : vector<2x64xf32>
    %157 = arith.mulf %152, %154 : vector<2x64xf32>
    %158 = arith.addf %156, %157 : vector<2x64xf32>
    %159 = math.tanh %158 : vector<2x64xf32>
    %160 = arith.mulf %155, %159 : vector<2x64xf32>
    %cst_29 = arith.constant dense<0.000000e+00> : vector<2x256xf32>
    %161 = tpu.matmul %160, %39, %cst_29 {dimension_numbers = #tpu.dot_dimension_numbers<[1], [0], [0], [1], [0, 0, 1, 1], [], []>} : vector<2x64xf32>, vector<64x256xf32>, vector<2x256xf32> -> vector<2x256xf32>
    %162 = arith.addf %38, %161 : vector<2x256xf32>
    %163 = arith.negf %162 : vector<2x256xf32>
    %164 = math.exp %163 : vector<2x256xf32>
    %cst_30 = arith.constant 1.000000e+00 : f32
    %165 = vector.broadcast %cst_30 : f32 to vector<2x256xf32>
    %166 = arith.addf %165, %164 : vector<2x256xf32>
    %167 = arith.divf %165, %166 : vector<2x256xf32>
    %168 = math.tanh %162 : vector<2x256xf32>
    %169 = vector.extract_strided_slice %167 {offsets = [0, 0], sizes = [2, 64], strides = [1, 1]} : vector<2x256xf32> to vector<2x64xf32>
    %170 = vector.extract_strided_slice %167 {offsets = [0, 64], sizes = [2, 64], strides = [1, 1]} : vector<2x256xf32> to vector<2x64xf32>
    %171 = vector.extract_strided_slice %168 {offsets = [0, 128], sizes = [2, 64], strides = [1, 1]} : vector<2x256xf32> to vector<2x64xf32>
    %172 = vector.extract_strided_slice %167 {offsets = [0, 192], sizes = [2, 64], strides = [1, 1]} : vector<2x256xf32> to vector<2x64xf32>
    %173 = arith.mulf %170, %158 : vector<2x64xf32>
    %174 = arith.mulf %169, %171 : vector<2x64xf32>
    %175 = arith.addf %173, %174 : vector<2x64xf32>
    %176 = math.tanh %175 : vector<2x64xf32>
    %177 = arith.mulf %172, %176 : vector<2x64xf32>
    %178 = tpu.concatenate %58, %75, %92, %109, %126, %143, %160, %177 in 0 : vector<2x64xf32>, vector<2x64xf32>, vector<2x64xf32>, vector<2x64xf32>, vector<2x64xf32>, vector<2x64xf32>, vector<2x64xf32>, vector<2x64xf32> -> vector<16x64xf32>
    %c0_31 = arith.constant 0 : index
    %c0_32 = arith.constant 0 : index
    %179 = vector.load %arg6[%c0_31, %c0_32] : memref<64x256xf32, #tpu.memory_space<vmem>>, vector<64x256xf32>
    %cst_33 = arith.constant dense<0.000000e+00> : vector<16x256xf32>
    %180 = tpu.matmul %178, %179, %cst_33 {dimension_numbers = #tpu.dot_dimension_numbers<[1], [0], [0], [1], [0, 0, 1, 1], [], []>} : vector<16x64xf32>, vector<64x256xf32>, vector<16x256xf32> -> vector<16x256xf32>
    %c0_34 = arith.constant 0 : index
    %c0_35 = arith.constant 0 : index
    %181 = vector.load %arg8[%c0_34, %c0_35] : memref<1x256xf32, #tpu.memory_space<vmem>>, vector<1x256xf32>
    %182 = vector.broadcast %181 : vector<1x256xf32> to vector<16x256xf32>
    %183 = arith.addf %180, %182 : vector<16x256xf32>
    %c0_36 = arith.constant 0 : index
    %c0_37 = arith.constant 0 : index
    %184 = vector.load %arg7[%c0_36, %c0_37] : memref<64x256xf32, #tpu.memory_space<vmem>>, vector<64x256xf32>
    %cst_38 = arith.constant dense<0.000000e+00> : vector<16x256xf32>
    %185 = tpu.matmul %178, %184, %cst_38 {dimension_numbers = #tpu.dot_dimension_numbers<[1], [0], [0], [1], [0, 0, 1, 1], [], []>} : vector<16x64xf32>, vector<64x256xf32>, vector<16x256xf32> -> vector<16x256xf32>
    %186 = vector.extract_strided_slice %183 {offsets = [0, 0], sizes = [2, 256], strides = [1, 1]} : vector<16x256xf32> to vector<2x256xf32>
    %187 = vector.extract_strided_slice %185 {offsets = [14, 0], sizes = [2, 256], strides = [1, 1]} : vector<16x256xf32> to vector<2x256xf32>
    %188 = arith.addf %186, %187 : vector<2x256xf32>
    %189 = vector.extract_strided_slice %183 {offsets = [2, 0], sizes = [2, 256], strides = [1, 1]} : vector<16x256xf32> to vector<2x256xf32>
    %190 = vector.extract_strided_slice %185 {offsets = [12, 0], sizes = [2, 256], strides = [1, 1]} : vector<16x256xf32> to vector<2x256xf32>
    %191 = arith.addf %189, %190 : vector<2x256xf32>
    %192 = vector.extract_strided_slice %183 {offsets = [4, 0], sizes = [2, 256], strides = [1, 1]} : vector<16x256xf32> to vector<2x256xf32>
    %193 = vector.extract_strided_slice %185 {offsets = [10, 0], sizes = [2, 256], strides = [1, 1]} : vector<16x256xf32> to vector<2x256xf32>
    %194 = arith.addf %192, %193 : vector<2x256xf32>
    %195 = vector.extract_strided_slice %183 {offsets = [6, 0], sizes = [2, 256], strides = [1, 1]} : vector<16x256xf32> to vector<2x256xf32>
    %196 = vector.extract_strided_slice %185 {offsets = [8, 0], sizes = [2, 256], strides = [1, 1]} : vector<16x256xf32> to vector<2x256xf32>
    %197 = arith.addf %195, %196 : vector<2x256xf32>
    %198 = vector.extract_strided_slice %183 {offsets = [8, 0], sizes = [2, 256], strides = [1, 1]} : vector<16x256xf32> to vector<2x256xf32>
    %199 = vector.extract_strided_slice %185 {offsets = [6, 0], sizes = [2, 256], strides = [1, 1]} : vector<16x256xf32> to vector<2x256xf32>
    %200 = arith.addf %198, %199 : vector<2x256xf32>
    %201 = vector.extract_strided_slice %183 {offsets = [10, 0], sizes = [2, 256], strides = [1, 1]} : vector<16x256xf32> to vector<2x256xf32>
    %202 = vector.extract_strided_slice %185 {offsets = [4, 0], sizes = [2, 256], strides = [1, 1]} : vector<16x256xf32> to vector<2x256xf32>
    %203 = arith.addf %201, %202 : vector<2x256xf32>
    %204 = vector.extract_strided_slice %183 {offsets = [12, 0], sizes = [2, 256], strides = [1, 1]} : vector<16x256xf32> to vector<2x256xf32>
    %205 = vector.extract_strided_slice %185 {offsets = [2, 0], sizes = [2, 256], strides = [1, 1]} : vector<16x256xf32> to vector<2x256xf32>
    %206 = arith.addf %204, %205 : vector<2x256xf32>
    %207 = vector.extract_strided_slice %183 {offsets = [14, 0], sizes = [2, 256], strides = [1, 1]} : vector<16x256xf32> to vector<2x256xf32>
    %208 = vector.extract_strided_slice %185 {offsets = [0, 0], sizes = [2, 256], strides = [1, 1]} : vector<16x256xf32> to vector<2x256xf32>
    %209 = arith.addf %207, %208 : vector<2x256xf32>
    %c0_39 = arith.constant 0 : index
    %c0_40 = arith.constant 0 : index
    %210 = vector.load %arg9[%c0_39, %c0_40] : memref<64x256xf32, #tpu.memory_space<vmem>>, vector<64x256xf32>
    %cst_41 = arith.constant 0.000000e+00 : f32
    %211 = vector.broadcast %cst_41 : f32 to vector<2x64xf32>
    %cst_42 = arith.constant 0.000000e+00 : f32
    %212 = vector.broadcast %cst_42 : f32 to vector<2x64xf32>
    %cst_43 = arith.constant dense<0.000000e+00> : vector<2x256xf32>
    %213 = tpu.matmul %211, %210, %cst_43 {dimension_numbers = #tpu.dot_dimension_numbers<[1], [0], [0], [1], [0, 0, 1, 1], [], []>} : vector<2x64xf32>, vector<64x256xf32>, vector<2x256xf32> -> vector<2x256xf32>
    %214 = arith.addf %188, %213 : vector<2x256xf32>
    %215 = arith.negf %214 : vector<2x256xf32>
    %216 = math.exp %215 : vector<2x256xf32>
    %cst_44 = arith.constant 1.000000e+00 : f32
    %217 = vector.broadcast %cst_44 : f32 to vector<2x256xf32>
    %218 = arith.addf %217, %216 : vector<2x256xf32>
    %219 = arith.divf %217, %218 : vector<2x256xf32>
    %220 = math.tanh %214 : vector<2x256xf32>
    %221 = vector.extract_strided_slice %219 {offsets = [0, 0], sizes = [2, 64], strides = [1, 1]} : vector<2x256xf32> to vector<2x64xf32>
    %222 = vector.extract_strided_slice %219 {offsets = [0, 64], sizes = [2, 64], strides = [1, 1]} : vector<2x256xf32> to vector<2x64xf32>
    %223 = vector.extract_strided_slice %220 {offsets = [0, 128], sizes = [2, 64], strides = [1, 1]} : vector<2x256xf32> to vector<2x64xf32>
    %224 = vector.extract_strided_slice %219 {offsets = [0, 192], sizes = [2, 64], strides = [1, 1]} : vector<2x256xf32> to vector<2x64xf32>
    %225 = arith.mulf %222, %212 : vector<2x64xf32>
    %226 = arith.mulf %221, %223 : vector<2x64xf32>
    %227 = arith.addf %225, %226 : vector<2x64xf32>
    %228 = math.tanh %227 : vector<2x64xf32>
    %229 = arith.mulf %224, %228 : vector<2x64xf32>
    %cst_45 = arith.constant dense<0.000000e+00> : vector<2x256xf32>
    %230 = tpu.matmul %229, %210, %cst_45 {dimension_numbers = #tpu.dot_dimension_numbers<[1], [0], [0], [1], [0, 0, 1, 1], [], []>} : vector<2x64xf32>, vector<64x256xf32>, vector<2x256xf32> -> vector<2x256xf32>
    %231 = arith.addf %191, %230 : vector<2x256xf32>
    %232 = arith.negf %231 : vector<2x256xf32>
    %233 = math.exp %232 : vector<2x256xf32>
    %cst_46 = arith.constant 1.000000e+00 : f32
    %234 = vector.broadcast %cst_46 : f32 to vector<2x256xf32>
    %235 = arith.addf %234, %233 : vector<2x256xf32>
    %236 = arith.divf %234, %235 : vector<2x256xf32>
    %237 = math.tanh %231 : vector<2x256xf32>
    %238 = vector.extract_strided_slice %236 {offsets = [0, 0], sizes = [2, 64], strides = [1, 1]} : vector<2x256xf32> to vector<2x64xf32>
    %239 = vector.extract_strided_slice %236 {offsets = [0, 64], sizes = [2, 64], strides = [1, 1]} : vector<2x256xf32> to vector<2x64xf32>
    %240 = vector.extract_strided_slice %237 {offsets = [0, 128], sizes = [2, 64], strides = [1, 1]} : vector<2x256xf32> to vector<2x64xf32>
    %241 = vector.extract_strided_slice %236 {offsets = [0, 192], sizes = [2, 64], strides = [1, 1]} : vector<2x256xf32> to vector<2x64xf32>
    %242 = arith.mulf %239, %227 : vector<2x64xf32>
    %243 = arith.mulf %238, %240 : vector<2x64xf32>
    %244 = arith.addf %242, %243 : vector<2x64xf32>
    %245 = math.tanh %244 : vector<2x64xf32>
    %246 = arith.mulf %241, %245 : vector<2x64xf32>
    %cst_47 = arith.constant dense<0.000000e+00> : vector<2x256xf32>
    %247 = tpu.matmul %246, %210, %cst_47 {dimension_numbers = #tpu.dot_dimension_numbers<[1], [0], [0], [1], [0, 0, 1, 1], [], []>} : vector<2x64xf32>, vector<64x256xf32>, vector<2x256xf32> -> vector<2x256xf32>
    %248 = arith.addf %194, %247 : vector<2x256xf32>
    %249 = arith.negf %248 : vector<2x256xf32>
    %250 = math.exp %249 : vector<2x256xf32>
    %cst_48 = arith.constant 1.000000e+00 : f32
    %251 = vector.broadcast %cst_48 : f32 to vector<2x256xf32>
    %252 = arith.addf %251, %250 : vector<2x256xf32>
    %253 = arith.divf %251, %252 : vector<2x256xf32>
    %254 = math.tanh %248 : vector<2x256xf32>
    %255 = vector.extract_strided_slice %253 {offsets = [0, 0], sizes = [2, 64], strides = [1, 1]} : vector<2x256xf32> to vector<2x64xf32>
    %256 = vector.extract_strided_slice %253 {offsets = [0, 64], sizes = [2, 64], strides = [1, 1]} : vector<2x256xf32> to vector<2x64xf32>
    %257 = vector.extract_strided_slice %254 {offsets = [0, 128], sizes = [2, 64], strides = [1, 1]} : vector<2x256xf32> to vector<2x64xf32>
    %258 = vector.extract_strided_slice %253 {offsets = [0, 192], sizes = [2, 64], strides = [1, 1]} : vector<2x256xf32> to vector<2x64xf32>
    %259 = arith.mulf %256, %244 : vector<2x64xf32>
    %260 = arith.mulf %255, %257 : vector<2x64xf32>
    %261 = arith.addf %259, %260 : vector<2x64xf32>
    %262 = math.tanh %261 : vector<2x64xf32>
    %263 = arith.mulf %258, %262 : vector<2x64xf32>
    %cst_49 = arith.constant dense<0.000000e+00> : vector<2x256xf32>
    %264 = tpu.matmul %263, %210, %cst_49 {dimension_numbers = #tpu.dot_dimension_numbers<[1], [0], [0], [1], [0, 0, 1, 1], [], []>} : vector<2x64xf32>, vector<64x256xf32>, vector<2x256xf32> -> vector<2x256xf32>
    %265 = arith.addf %197, %264 : vector<2x256xf32>
    %266 = arith.negf %265 : vector<2x256xf32>
    %267 = math.exp %266 : vector<2x256xf32>
    %cst_50 = arith.constant 1.000000e+00 : f32
    %268 = vector.broadcast %cst_50 : f32 to vector<2x256xf32>
    %269 = arith.addf %268, %267 : vector<2x256xf32>
    %270 = arith.divf %268, %269 : vector<2x256xf32>
    %271 = math.tanh %265 : vector<2x256xf32>
    %272 = vector.extract_strided_slice %270 {offsets = [0, 0], sizes = [2, 64], strides = [1, 1]} : vector<2x256xf32> to vector<2x64xf32>
    %273 = vector.extract_strided_slice %270 {offsets = [0, 64], sizes = [2, 64], strides = [1, 1]} : vector<2x256xf32> to vector<2x64xf32>
    %274 = vector.extract_strided_slice %271 {offsets = [0, 128], sizes = [2, 64], strides = [1, 1]} : vector<2x256xf32> to vector<2x64xf32>
    %275 = vector.extract_strided_slice %270 {offsets = [0, 192], sizes = [2, 64], strides = [1, 1]} : vector<2x256xf32> to vector<2x64xf32>
    %276 = arith.mulf %273, %261 : vector<2x64xf32>
    %277 = arith.mulf %272, %274 : vector<2x64xf32>
    %278 = arith.addf %276, %277 : vector<2x64xf32>
    %279 = math.tanh %278 : vector<2x64xf32>
    %280 = arith.mulf %275, %279 : vector<2x64xf32>
    %cst_51 = arith.constant dense<0.000000e+00> : vector<2x256xf32>
    %281 = tpu.matmul %280, %210, %cst_51 {dimension_numbers = #tpu.dot_dimension_numbers<[1], [0], [0], [1], [0, 0, 1, 1], [], []>} : vector<2x64xf32>, vector<64x256xf32>, vector<2x256xf32> -> vector<2x256xf32>
    %282 = arith.addf %200, %281 : vector<2x256xf32>
    %283 = arith.negf %282 : vector<2x256xf32>
    %284 = math.exp %283 : vector<2x256xf32>
    %cst_52 = arith.constant 1.000000e+00 : f32
    %285 = vector.broadcast %cst_52 : f32 to vector<2x256xf32>
    %286 = arith.addf %285, %284 : vector<2x256xf32>
    %287 = arith.divf %285, %286 : vector<2x256xf32>
    %288 = math.tanh %282 : vector<2x256xf32>
    %289 = vector.extract_strided_slice %287 {offsets = [0, 0], sizes = [2, 64], strides = [1, 1]} : vector<2x256xf32> to vector<2x64xf32>
    %290 = vector.extract_strided_slice %287 {offsets = [0, 64], sizes = [2, 64], strides = [1, 1]} : vector<2x256xf32> to vector<2x64xf32>
    %291 = vector.extract_strided_slice %288 {offsets = [0, 128], sizes = [2, 64], strides = [1, 1]} : vector<2x256xf32> to vector<2x64xf32>
    %292 = vector.extract_strided_slice %287 {offsets = [0, 192], sizes = [2, 64], strides = [1, 1]} : vector<2x256xf32> to vector<2x64xf32>
    %293 = arith.mulf %290, %278 : vector<2x64xf32>
    %294 = arith.mulf %289, %291 : vector<2x64xf32>
    %295 = arith.addf %293, %294 : vector<2x64xf32>
    %296 = math.tanh %295 : vector<2x64xf32>
    %297 = arith.mulf %292, %296 : vector<2x64xf32>
    %cst_53 = arith.constant dense<0.000000e+00> : vector<2x256xf32>
    %298 = tpu.matmul %297, %210, %cst_53 {dimension_numbers = #tpu.dot_dimension_numbers<[1], [0], [0], [1], [0, 0, 1, 1], [], []>} : vector<2x64xf32>, vector<64x256xf32>, vector<2x256xf32> -> vector<2x256xf32>
    %299 = arith.addf %203, %298 : vector<2x256xf32>
    %300 = arith.negf %299 : vector<2x256xf32>
    %301 = math.exp %300 : vector<2x256xf32>
    %cst_54 = arith.constant 1.000000e+00 : f32
    %302 = vector.broadcast %cst_54 : f32 to vector<2x256xf32>
    %303 = arith.addf %302, %301 : vector<2x256xf32>
    %304 = arith.divf %302, %303 : vector<2x256xf32>
    %305 = math.tanh %299 : vector<2x256xf32>
    %306 = vector.extract_strided_slice %304 {offsets = [0, 0], sizes = [2, 64], strides = [1, 1]} : vector<2x256xf32> to vector<2x64xf32>
    %307 = vector.extract_strided_slice %304 {offsets = [0, 64], sizes = [2, 64], strides = [1, 1]} : vector<2x256xf32> to vector<2x64xf32>
    %308 = vector.extract_strided_slice %305 {offsets = [0, 128], sizes = [2, 64], strides = [1, 1]} : vector<2x256xf32> to vector<2x64xf32>
    %309 = vector.extract_strided_slice %304 {offsets = [0, 192], sizes = [2, 64], strides = [1, 1]} : vector<2x256xf32> to vector<2x64xf32>
    %310 = arith.mulf %307, %295 : vector<2x64xf32>
    %311 = arith.mulf %306, %308 : vector<2x64xf32>
    %312 = arith.addf %310, %311 : vector<2x64xf32>
    %313 = math.tanh %312 : vector<2x64xf32>
    %314 = arith.mulf %309, %313 : vector<2x64xf32>
    %cst_55 = arith.constant dense<0.000000e+00> : vector<2x256xf32>
    %315 = tpu.matmul %314, %210, %cst_55 {dimension_numbers = #tpu.dot_dimension_numbers<[1], [0], [0], [1], [0, 0, 1, 1], [], []>} : vector<2x64xf32>, vector<64x256xf32>, vector<2x256xf32> -> vector<2x256xf32>
    %316 = arith.addf %206, %315 : vector<2x256xf32>
    %317 = arith.negf %316 : vector<2x256xf32>
    %318 = math.exp %317 : vector<2x256xf32>
    %cst_56 = arith.constant 1.000000e+00 : f32
    %319 = vector.broadcast %cst_56 : f32 to vector<2x256xf32>
    %320 = arith.addf %319, %318 : vector<2x256xf32>
    %321 = arith.divf %319, %320 : vector<2x256xf32>
    %322 = math.tanh %316 : vector<2x256xf32>
    %323 = vector.extract_strided_slice %321 {offsets = [0, 0], sizes = [2, 64], strides = [1, 1]} : vector<2x256xf32> to vector<2x64xf32>
    %324 = vector.extract_strided_slice %321 {offsets = [0, 64], sizes = [2, 64], strides = [1, 1]} : vector<2x256xf32> to vector<2x64xf32>
    %325 = vector.extract_strided_slice %322 {offsets = [0, 128], sizes = [2, 64], strides = [1, 1]} : vector<2x256xf32> to vector<2x64xf32>
    %326 = vector.extract_strided_slice %321 {offsets = [0, 192], sizes = [2, 64], strides = [1, 1]} : vector<2x256xf32> to vector<2x64xf32>
    %327 = arith.mulf %324, %312 : vector<2x64xf32>
    %328 = arith.mulf %323, %325 : vector<2x64xf32>
    %329 = arith.addf %327, %328 : vector<2x64xf32>
    %330 = math.tanh %329 : vector<2x64xf32>
    %331 = arith.mulf %326, %330 : vector<2x64xf32>
    %cst_57 = arith.constant dense<0.000000e+00> : vector<2x256xf32>
    %332 = tpu.matmul %331, %210, %cst_57 {dimension_numbers = #tpu.dot_dimension_numbers<[1], [0], [0], [1], [0, 0, 1, 1], [], []>} : vector<2x64xf32>, vector<64x256xf32>, vector<2x256xf32> -> vector<2x256xf32>
    %333 = arith.addf %209, %332 : vector<2x256xf32>
    %334 = arith.negf %333 : vector<2x256xf32>
    %335 = math.exp %334 : vector<2x256xf32>
    %cst_58 = arith.constant 1.000000e+00 : f32
    %336 = vector.broadcast %cst_58 : f32 to vector<2x256xf32>
    %337 = arith.addf %336, %335 : vector<2x256xf32>
    %338 = arith.divf %336, %337 : vector<2x256xf32>
    %339 = math.tanh %333 : vector<2x256xf32>
    %340 = vector.extract_strided_slice %338 {offsets = [0, 0], sizes = [2, 64], strides = [1, 1]} : vector<2x256xf32> to vector<2x64xf32>
    %341 = vector.extract_strided_slice %338 {offsets = [0, 64], sizes = [2, 64], strides = [1, 1]} : vector<2x256xf32> to vector<2x64xf32>
    %342 = vector.extract_strided_slice %339 {offsets = [0, 128], sizes = [2, 64], strides = [1, 1]} : vector<2x256xf32> to vector<2x64xf32>
    %343 = vector.extract_strided_slice %338 {offsets = [0, 192], sizes = [2, 64], strides = [1, 1]} : vector<2x256xf32> to vector<2x64xf32>
    %344 = arith.mulf %341, %329 : vector<2x64xf32>
    %345 = arith.mulf %340, %342 : vector<2x64xf32>
    %346 = arith.addf %344, %345 : vector<2x64xf32>
    %347 = math.tanh %346 : vector<2x64xf32>
    %348 = arith.mulf %343, %347 : vector<2x64xf32>
    %c0_59 = arith.constant 0 : index
    %c0_60 = arith.constant 0 : index
    %349 = vector.load %arg10[%c0_59, %c0_60] : memref<64x4xf32, #tpu.memory_space<vmem>>, vector<64x4xf32>
    %cst_61 = arith.constant dense<0.000000e+00> : vector<2x4xf32>
    %350 = tpu.matmul %348, %349, %cst_61 {dimension_numbers = #tpu.dot_dimension_numbers<[1], [0], [0], [1], [0, 0, 1, 1], [], []>} : vector<2x64xf32>, vector<64x4xf32>, vector<2x4xf32> -> vector<2x4xf32>
    %c0_62 = arith.constant 0 : index
    %c0_63 = arith.constant 0 : index
    %351 = vector.load %arg11[%c0_62, %c0_63] : memref<64x4xf32, #tpu.memory_space<vmem>>, vector<64x4xf32>
    %cst_64 = arith.constant dense<0.000000e+00> : vector<2x4xf32>
    %352 = tpu.matmul %229, %351, %cst_64 {dimension_numbers = #tpu.dot_dimension_numbers<[1], [0], [0], [1], [0, 0, 1, 1], [], []>} : vector<2x64xf32>, vector<64x4xf32>, vector<2x4xf32> -> vector<2x4xf32>
    %353 = arith.addf %350, %352 : vector<2x4xf32>
    %c0_65 = arith.constant 0 : index
    %c0_66 = arith.constant 0 : index
    %354 = vector.load %arg12[%c0_65, %c0_66] : memref<1x4xf32, #tpu.memory_space<vmem>>, vector<1x4xf32>
    %355 = vector.broadcast %354 : vector<1x4xf32> to vector<2x4xf32>
    %356 = arith.addf %353, %355 : vector<2x4xf32>
    %c0_67 = arith.constant 0 : index
    %c0_68 = arith.constant 0 : index
    %357 = vector.load %arg13[%c0_67, %c0_68] : memref<2x4xf32, #tpu.memory_space<vmem>>, vector<2x4xf32>
    tpu.vector_store %arg13[%c0_67, %c0_68], %356 {strides = array<i32>} : memref<2x4xf32, #tpu.memory_space<vmem>>, vector<2x4xf32>,
    return
  }
}

</mosaic_0001>

<bundles_post_ra>
// kernel: textrnn_forward.1
= control target key start
LH: loop header
LB: loop body
LE: loop exit
PB: predicated region body
PF: predicated region fallthrough
CT: control target
= control target key end

     0   :  { %v3304_v2 = vmov 0   ;;  %s4126_s0 = inlined_call_operand.vmem [shape: s32[16,1], index: 0, kind: input, shape index: {}]   ;;  %s4127_s1 = inlined_call_operand.vmem [shape: f32[128,32], index: 1, kind: input, shape index: {}]   ;;  %s4128_s2 = inlined_call_operand.vmem [shape: f32[32,256], index: 2, kind: input, shape index: {}]   ;;  %s4129_s3 = inlined_call_operand.vmem [shape: f32[32,256], index: 3, kind: input, shape index: {}]   ;;  %s4130_s4 = inlined_call_operand.vmem [shape: f32[1,256], index: 4, kind: input, shape index: {}]   ;;  %s4131_s5 = inlined_call_operand.vmem [shape: f32[64,256], index: 5, kind: input, shape index: {}]   ;;  %s4132_s6 = inlined_call_operand.vmem [shape: f32[64,256], index: 6, kind: input, shape index: {}]   ;;  %s4133_s7 = inlined_call_operand.vmem [shape: f32[64,256], index: 7, kind: input, shape index: {}]   ;;  %s4134_s8 = inlined_call_operand.vmem [shape: f32[1,256], index: 8, kind: input, shape index: {}]   ;;  %s4135_s9 = inlined_call_operand.vmem [shape: f32[64,256], index: 9, kind: input, shape index: {}]   ;;  %s4136_s10 = inlined_call_operand.vmem [shape: f32[64,4], index: 10, kind: input, shape index: {}]   ;;  %s4137_s11 = inlined_call_operand.vmem [shape: f32[64,4], index: 11, kind: input, shape index: {}]   ;;  %s4138_s12 = inlined_call_operand.vmem [shape: f32[1,4], index: 12, kind: input, shape index: {}]   ;;  %s4139_s13 = inlined_call_operand.hbm [shape: f32[2,4], index: 13, kind: output, shape index: {}]  }
   0x1   :  { %v45_v0 = vld [vmem:[%s4126_s0] sm:$0xff]  ;;  %3087 = vset.pattern.permute.xlu0 %v3304_v2  ;;  %v62_v3 = vld [vmem:[%s4127_s1 + $0x8] sm:$0xff]  ;;  %v63_v4 = vld [vmem:[%s4127_s1 + $0x10] sm:$0xff] }
   0x2   :  { %v61_v1 = vld [vmem:[%s4127_s1] sm:$0xff]  ;;  %v64_v5 = vld [vmem:[%s4127_s1 + $0x18] sm:$0xff]  ;;  %50 = vperm.xlu0 %3087, %v45_v0   ;;  %v46_v8 = vld [vmem:[%s4126_s0 + $0x8] sm:$0xff] }
   0x3   :  { %v2720_v6 = vpack.c.bf16 %v62_v3, %v61_v1  ;;  %v2724_v7 = vpack.c.bf16 %v64_v5, %v63_v4  ;;  %v65_v9 = vld [vmem:[%s4127_s1 + $0x20] sm:$0xff]  ;;  %v66_v10 = vld [vmem:[%s4127_s1 + $0x28] sm:$0xff]  ;;  %v67_v12 = vld [vmem:[%s4127_s1 + $0x30] sm:$0xff] }
   0x4   :  { %v2728_v11 = vpack.c.bf16 %v66_v10, %v65_v9  ;;  %v68_v13 = vld [vmem:[%s4127_s1 + $0x38] sm:$0xff] }
   0x5   :  { %2721 = vmatprep.subr.bf16.mxu0 %v2720_v6 }
   0x6   :  { %2723 = vmatpush3.bf16.msra.mxu0 %v2720_v6  ;;  %53 = vperm.xlu0 %3087, %v46_v8  }
   0x7   :  { %2725 = vmatprep.subr.bf16.mxu0 %v2724_v7 }
   0x8   :  { %18 = vsyncpa [#allocation3], 0  ;;  %v153_v14 = vld [vmem:[%s4128_s2 + $0x8] sm:$0xff]  ;;  %v155_v15 = vld [vmem:[%s4128_s2 + $0x18] sm:$0xff]  ;;  %v2732_v25 = vpack.c.bf16 %v68_v13, %v67_v12  ;;  %v47_v39 = vlaneseq  ;;  %v3305_v42 = vmov 1.0   ;;  %v3306_v47 = vmov 0.0  }
   0x9   :  { %v152_v16 = vld [vmem:[%s4128_s2] sm:$0xff]  ;;  %v2752_v17 = vpack.c.bf16 %v155_v15, %v153_v14  ;;  %v154_v18 = vld [vmem:[%s4128_s2 + $0x10] sm:$0xff]  ;;  %v157_v19 = vld [vmem:[%s4128_s2 + $0x28] sm:$0xff]  ;;  %243 = vmatprep.mubr.f32.mxu1 %v3306_v47  ;;  %vm172_vm2 = vcmask 261120   ;;  %vm385_vm3 = vcmask 523264   ;;  %vm1246_vm4 = vcmask 1041408  }
   0xa   :  { %v159_v20 = vld [vmem:[%s4128_s2 + $0x38] sm:$0xff]  ;;  %2727 = vmatpush3.bf16.msra.mxu0 %v2724_v7  ;;  %v2754_v21 = vpack.c.bf16 %v154_v18, %v152_v16  ;;  %v156_v23 = vld [vmem:[%s4128_s2 + $0x20] sm:$0xff]  ;;  %v158_v24 = vld [vmem:[%s4128_s2 + $0x30] sm:$0xff]  ;;  %v48_v40 = vand.u32 127, %v47_v39  ;;  %vm1248_vm5 = vcmask 1043456   ;;  %vm1250_vm6 = vcmask 1045504  }
   0xb   :  { %v2756_v22 = vpack.c.bf16 %v159_v20, %v157_v19  ;;  %2729 = vmatprep.subr.bf16.mxu0 %v2728_v11  ;;  %2753 = vmatprep.subr.bf16.mxu1 %v2752_v17  ;;  %v69_v26 = vld [vmem:[%s4127_s1 + $0x40] sm:$0xff]  ;;  %v70_v27 = vld [vmem:[%s4127_s1 + $0x48] sm:$0xff]  ;;  %v2758_v28 = vpack.c.bf16 %v158_v24, %v156_v23  ;;  %v71_v30 = vld [vmem:[%s4127_s1 + $0x50] sm:$0xff]  ;;  %v3587_v19 = vshrl.u32 %v47_v39, 7  ;;  %vm3309_vm7 = vmmov 0   ;;  %s3310_s20 = smov [#allocation2]  }
   0xc   :  { %2755 = vmatpush1.bf16.msra.mxu1 %v2754_v21  ;;  %v2736_v29 = vpack.c.bf16 %v70_v27, %v69_v26  ;;  %v72_v31 = vld [vmem:[%s4127_s1 + $0x58] sm:$0xff]  ;;  %v73_v33 = vld [vmem:[%s4127_s1 + $0x60] sm:$0xff]  ;;  %v74_v34 = vld [vmem:[%s4127_s1 + $0x68] sm:$0xff]  ;;  %s2542_s21 = sshll.u32 %s3310_s20, 4  ;;  %vm2534_vm8 = vcmask 25600   ;;  %s2543_s21 = int_to_ptr.vmem [resolvable:$true] %s2542_s21 }
   0xd   :  { %2757 = vmatprep.subr.bf16.mxu1 %v2756_v22  ;;  %v2740_v32 = vpack.c.bf16 %v72_v31, %v71_v30  ;;  %v2744_v35 = vpack.c.bf16 %v74_v34, %v73_v33  ;;  %v75_v36 = vld [vmem:[%s4127_s1 + $0x70] sm:$0xff]  ;;  %v76_v37 = vld [vmem:[%s4127_s1 + $0x78] sm:$0xff]  ;;  %v257_v44 = vld [vmem:[%s4129_s3 + $0x8] sm:$0xff]  ;;  %v164_v20 = vsub.s32 0, %v3587_v19  ;;  %v168_v23 = vsub.s32 1, %v3587_v19  ;;  %s3280_s22 = scalar_lea.vmem %s2543_s21, 32  ;;  %p3285_p1 = scmp.lt.s32.totalorder %s2543_s21, %s2543_s21 }
   0xe   :  { %2731 = vmatpush3.bf16.msra.mxu0 %v2728_v11  ;;  %v2748_v38 = vpack.c.bf16 %v76_v37, %v75_v36  ;;  %v259_v45 = vld [vmem:[%s4129_s3 + $0x18] sm:$0xff]  ;;  %v370_v48 = vld [vmem:[%s4131_s5 + $0x8] sm:$0xff]  ;;  %v369_v51 = vld [vmem:[%s4131_s5] sm:$0xff]  ;;  %p3281_p0 = scmp.ne.s32.totalorder %s2543_s21, %s3280_s22  ;;  %p3286_p2 = scmp.lt.s32.totalorder %s3280_s22, %s3280_s22 }
   0xf   :  { %2733 = vmatprep.subr.bf16.mxu0 %v2732_v25  ;;  %v2760_v46 = vpack.c.bf16 %v259_v45, %v257_v44  ;;  %v372_v49 = vld [vmem:[%s4131_s5 + $0x18] sm:$0xff]  ;;  %v371_v52 = vld [vmem:[%s4131_s5 + $0x10] sm:$0xff]  ;;  %v374_v54 = vld [vmem:[%s4131_s5 + $0x28] sm:$0xff] }
  0x10   :  { %2759 = vmatpush1.bf16.msra.mxu1 %v2758_v28  ;;  %v3474_v50 = vpack.c.bf16 %v372_v49, %v370_v48  ;;  %v3482_v53 = vpack.c.bf16 %v371_v52, %v369_v51  ;;  %v376_v55 = vld [vmem:[%s4131_s5 + $0x38] sm:$0xff]  ;;  %v373_v57 = vld [vmem:[%s4131_s5 + $0x20] sm:$0xff]  ;;  %v375_v58 = vld [vmem:[%s4131_s5 + $0x30] sm:$0xff]  ;;  %p3287_p3 = por %p3286_p2, %p3285_p1 }
  0x11   :  { %2761 = vmatprep.subr.bf16.mxu1 %v2760_v46  ;;  %v3492_v56 = vpack.c.bf16 %v376_v55, %v374_v54  ;;  %v3500_v59 = vpack.c.bf16 %v375_v58, %v373_v57  ;;  %v378_v60 = vld [vmem:[%s4131_s5 + $0x48] sm:$0xff]  ;;  %v380_v61 = vld [vmem:[%s4131_s5 + $0x58] sm:$0xff]  ;;  %v377_v63 = vld [vmem:[%s4131_s5 + $0x40] sm:$0xff] }
  0x12   :  { %2735 = vmatpush3.bf16.msra.mxu0 %v2732_v25  ;;  %v3510_v62 = vpack.c.bf16 %v380_v61, %v378_v60  ;;  %v379_v0 = vld [vmem:[%s4131_s5 + $0x50] sm:$0xff]  ;;  %v382_v2 = vld [vmem:[%s4131_s5 + $0x68] sm:$0xff]  ;;  %v384_v3 = vld [vmem:[%s4131_s5 + $0x78] sm:$0xff]  ;;  %p3288_p4 = pnand %p3287_p3, %p3281_p0 }
  0x13   :  { %2737 = vmatprep.subr.bf16.mxu0 %v2736_v29  ;;  %v3518_v1 = vpack.c.bf16 %v379_v0, %v377_v63  ;;  %v3528_v4 = vpack.c.bf16 %v384_v3, %v382_v2  ;;  %v381_v5 = vld [vmem:[%s4131_s5 + $0x60] sm:$0xff]  ;;  %v383_v6 = vld [vmem:[%s4131_s5 + $0x70] sm:$0xff]  ;;  %v261_v10 = vld [vmem:[%s4129_s3 + $0x28] sm:$0xff] }
  0x14   :  { %v3536_v7 = vpack.c.bf16 %v383_v6, %v381_v5  ;;  %v256_v8 = vld [vmem:[%s4129_s3] sm:$0xff]  ;;  %v258_v9 = vld [vmem:[%s4129_s3 + $0x10] sm:$0xff]  ;;  %v263_v11 = vld [vmem:[%s4129_s3 + $0x38] sm:$0xff] }
  0x15   :  { %v2762_v12 = vpack.c.bf16 %v258_v9, %v256_v8  ;;  %v2764_v14 = vpack.c.bf16 %v263_v11, %v261_v10  ;;  %v260_v15 = vld [vmem:[%s4129_s3 + $0x20] sm:$0xff]  ;;  %v262_v16 = vld [vmem:[%s4129_s3 + $0x30] sm:$0xff] }
  0x16   :  { %2739 = vmatpush3.bf16.msra.mxu0 %v2736_v29  ;;  %v2766_v18 = vpack.c.bf16 %v262_v16, %v260_v15  ;;  %v160_v21 = vld [vmem:[%s4130_s4] sm:$0x3]  ;;  %s3307_s4 = smov 64  }
  0x17   :  { %2741 = vmatprep.subr.bf16.mxu0 %v2740_v32  ;;  %v165_v25 = vrot.slane %v160_v21, %v164_v20  ;;  %v169_v26 = vrot.slane %v160_v21, %v168_v23 }
  0x1a   :  { %2743 = vmatpush3.bf16.msra.mxu0 %v2740_v32 }
  0x1b   :  { %2745 = vmatprep.subr.bf16.mxu0 %v2744_v35 }
  0x1e   :  { %2747 = vmatpush3.bf16.msra.mxu0 %v2744_v35 }
  0x1f   :  { %2749 = vmatprep.subr.bf16.mxu0 %v2748_v38 }
  0x22   :  { %2751 = vmatpush3.bf16.msra.mxu0 %v2748_v38 }
  0x23   :  { %2785 = vmatprep.subr.bf16.mxu0 %v3474_v50 }
  0x81   :  { %v51_v41 = vpop.permute.xlu0 %50 }
  0x82   :  { %vm55_vm0 = vcmp.eq.s32.totalorder %v48_v40, %v51_v41 }
  0x83   :  { %2679 = vmatprep.mubr.msk.f32.mxu0 %vm55_vm0, %v3305_v42 }
  0x85   :  { %v54_v43 = vpop.permute.xlu0 %53 }
  0x86   :  { %vm56_vm1 = vcmp.eq.s32.totalorder %v48_v40, %v54_v43 }
  0x87   :  { %2680 = vmatmul.mubr.msk.f32.vlgmr.msra.gmra.mrb[0].mxu0 %vm56_vm1, %v3305_v42 }
  0x88   :  { %553 = vmatprep.mubr.f32.mxu0 %v3306_v47  ;;  %2787 = vmatpush1.bf16.msra.mxu0 %v3482_v53 }
  0x89   :  { %2789 = vmatprep.subr.bf16.mxu0 %v3492_v56 }
  0x8c   :  { %2791 = vmatpush1.bf16.msra.mxu0 %v3500_v59 }
  0x8d   :  { %2793 = vmatprep.subr.bf16.mxu0 %v3510_v62 }
  0x90   :  { %2795 = vmatpush1.bf16.msra.mxu0 %v3518_v1 }
  0x91   :  { %2797 = vmatprep.subr.bf16.mxu0 %v3528_v4 }
  0x94   :  { %2799 = vmatpush1.bf16.msra.mxu0 %v3536_v7 }
  0x95   :  { %2817 = vmatprep.subr.bf16.mxu0 %v3474_v50 }
 0x15a   :  { %v2681_v13 = vpop.f32.mrb[0].mxu0 }
 0x15b   :  { %v143_v17 = vpop.f32.mrb[1].mxu0 }
 0x15c   :  { %2554 = vmatmul.mubr.msk.f32.vlgmr.msra.gmra.mrb[0].mxu1 %vm172_vm2, %v143_v17 }
 0x15d   :  { %2763 = vmatpush1.bf16.msra.mxu1 %v2762_v12  ;;  %249 = vmatprep.mubr.f32.mxu1 %v3306_v47 }
 0x15e   :  { %2765 = vmatprep.subr.bf16.mxu1 %v2764_v14 }
 0x160   :  { %2555 = vmatmul.mubr.msk.f32.gmra.mrb[2].mxu1 %vm172_vm2, %v2681_v13 }
 0x161   :  { %2767 = vmatpush1.bf16.msra.mxu1 %v2766_v18  ;;  %328 = vmatprep.mubr.f32.mxu1 %v3306_v47 }
 0x162   :  { %2769 = vmatprep.subr.bf16.mxu1 %v3474_v50 }
 0x164   :  { %2556 = vmatmul.mubr.msk.f32.vlgmr.msra.gmra.mrb[4].mxu1 %vm172_vm2, %v143_v17 }
 0x165   :  { %2771 = vmatpush1.bf16.msra.mxu1 %v3482_v53  ;;  %334 = vmatprep.mubr.f32.mxu1 %v3306_v47 }
 0x166   :  { %2773 = vmatprep.subr.bf16.mxu1 %v3492_v56 }
 0x168   :  { %2557 = vmatmul.mubr.msk.f32.gmra.mrb[6].mxu1 %vm172_vm2, %v2681_v13 }
 0x169   :  { %2775 = vmatpush1.bf16.msra.mxu1 %v3500_v59  ;;  %453 = vmatprep.mubr.f32.mxu1 %v3306_v47 }
 0x16a   :  { %2777 = vmatprep.subr.bf16.mxu1 %v3510_v62 }
 0x16d   :  { %2779 = vmatpush1.bf16.msra.mxu1 %v3518_v1 }
 0x16e   :  { %2781 = vmatprep.subr.bf16.mxu1 %v3528_v4 }
 0x171   :  { %2783 = vmatpush1.bf16.msra.mxu1 %v3536_v7 }
 0x172   :  { %2801 = vmatprep.subr.bf16.mxu1 %v3474_v50 }
 0x174   :  { %454 = vmatmul.mubr.f32.vlgmr.msra.gmra.mrb[8].mxu1 %v3306_v47 }
 0x175   :  { %2803 = vmatpush1.bf16.msra.mxu1 %v3482_v53  ;;  %663 = vmatprep.mubr.f32.mxu1 %v3306_v47 }
 0x176   :  { %2805 = vmatprep.subr.bf16.mxu1 %v3492_v56 }
 0x179   :  { %2807 = vmatpush1.bf16.msra.mxu1 %v3500_v59 }
 0x17a   :  { %2809 = vmatprep.subr.bf16.mxu1 %v3510_v62 }
 0x17d   :  { %2811 = vmatpush1.bf16.msra.mxu1 %v3518_v1 }
 0x17e   :  { %2813 = vmatprep.subr.bf16.mxu1 %v3528_v4 }
 0x181   :  { %2815 = vmatpush1.bf16.msra.mxu1 %v3536_v7 }
 0x182   :  { %2833 = vmatprep.subr.bf16.mxu1 %v3474_v50 }
 0x22f   :  { %v245_v22 = vpop.f32.mrb[0].mxu1 }
 0x230   :  { %v247_v24 = vpop.f32.mrb[1].mxu1  ;;  %v246_v42 = vadd.f32 %v245_v22, %v165_v25 }
 0x231   :  { %v248_v46 = vadd.f32 %v247_v24, %v169_v26 }
 0x233   :  { %v251_v27 = vpop.f32.mrb[2].mxu1 }
 0x234   :  { %v252_v28 = vadd.f32 %v251_v27, %v165_v25  ;;  %v253_v29 = vpop.f32.mrb[3].mxu1 }
 0x235   :  { %v254_v30 = vadd.f32 %v253_v29, %v169_v26 }
 0x237   :  { %v330_v31 = vpop.f32.mrb[4].mxu1 }
 0x238   :  { %v357_v32 = vrot.slane %v330_v31, 6  ;;  %v363_v33 = vrot.slane %v330_v31, 2  ;;  %v332_v34 = vpop.f32.mrb[5].mxu1 }
 0x239   :  { %v358_v35 = vrot.slane %v332_v34, 6  ;;  %v364_v36 = vrot.slane %v332_v34, 2 }
 0x23a   :  { %v3598_v37 = vadd.f32 %v363_v33, %v252_v28  ;;  %v3600_v38 = vadd.f32 %v357_v32, %v252_v28 }
 0x23b   :  { %v3602_v39 = vadd.f32 %v364_v36, %v254_v30  ;;  %v336_v40 = vpop.f32.mrb[6].mxu1  ;;  %v3604_v41 = vadd.f32 %v358_v35, %v254_v30 }
 0x23c   :  { %v343_v43 = vrot.slane %v336_v40, 6  ;;  %v349_v44 = vrot.slane %v336_v40, 2  ;;  %v338_v45 = vpop.f32.mrb[7].mxu1 }
 0x23d   :  { %v344_v48 = vrot.slane %v338_v45, 6  ;;  %v350_v49 = vrot.slane %v338_v45, 2 }
 0x23e   :  { %v3606_v51 = vadd.f32 %v349_v44, %v246_v42  ;;  %v3608_v52 = vadd.f32 %v343_v43, %v246_v42 }
 0x23f   :  { %v3610_v54 = vadd.f32 %v350_v49, %v248_v46  ;;  %v3612_v55 = vadd.f32 %v344_v48, %v248_v46 }
 0x247   :  { %v455_v57 = vpop.f32.mrb[8].mxu1 }
 0x248   :  { %v460_v58 = vadd.f32 %v455_v57, %v3608_v52  ;;  %v457_v60 = vpop.f32.mrb[9].mxu1 }
 0x249   :  { %v461_v63 = vadd.f32 %v457_v60, %v3612_v55 }
 0x24a   :  { %v2558_v61 = vmul.f32 -1.442695, %v460_v58 }
 0x24b   :  { %v2559_v8 = vmul.f32 -1.442695, %v461_v63 }
 0x24c   :  { %3088 = vpow2.f32 %v2558_v61 }
 0x24d   :  { %3090 = vtanh.f32 %v461_v63 }
 0x256   :  { %v3089_v0 = vpop.eup %3088 }
 0x257   :  { %v468_v2 = vadd.f32 1.0, %v3089_v0  ;;  %v3091_v3 = vpop.eup %3090 }
 0x259   :  { %3092 = vrcp.f32 %v468_v2 }
 0x25a   :  { %3094 = vpow2.f32 %v2559_v8 }
 0x263   :  { %v3093_v5 = vpop.eup %3092 }
 0x264   :  { %v476_v6 = vmul.f32 %v3093_v5, %v3091_v3  ;;  %v3095_v9 = vpop.eup %3094  ;;  %v475_v11 = vmul.f32 0.0, %v3093_v5 }
 0x265   :  { %v469_v10 = vadd.f32 1.0, %v3095_v9 }
 0x266   :  { %478 = vrot.lane.b32.xlu1 %v476_v6, %s3307_s4 }
 0x267   :  { %3096 = vrcp.f32 %v469_v10 }
 0x271   :  { %v3097_v14 = vpop.eup %3096 }
 0x2d8   :  { %v479_v12 = vpop.permute.xlu1 %478 }
 0x2d9   :  { %v481_v13 = vadd.f32 %v479_v12, %v475_v11 }
 0x2db   :  { %3098 = vtanh.f32 %v481_v13  ;;  %v582_v31 = vrot.slane %v481_v13, 6 }
 0x2e5   :  { %v3099_v15 = vpop.eup %3098 }
 0x2e6   :  { %v3617_v16 = vmul.f32 %v3099_v15, %v3097_v14 }
 0x2e8   :  { %485 = vrot.lane.b32.xlu1 %v3617_v16, %s3307_s4 }
 0x35a   :  { %v486_v17 = vpop.permute.xlu1 %485 }
 0x35b   :  { %2560 = vmatmul.mubr.msk.f32.vlgmr.msra.gmra.mrb[2].mxu0 %vm385_vm3, %v486_v17 }
 0x35c   :  { %2819 = vmatpush1.bf16.msra.mxu0 %v3482_v53  ;;  %773 = vmatprep.mubr.f32.mxu0 %v3306_v47 }
 0x35d   :  { %2821 = vmatprep.subr.bf16.mxu0 %v3492_v56 }
 0x360   :  { %2823 = vmatpush1.bf16.msra.mxu0 %v3500_v59 }
 0x361   :  { %2825 = vmatprep.subr.bf16.mxu0 %v3510_v62 }
 0x364   :  { %2827 = vmatpush1.bf16.msra.mxu0 %v3518_v1 }
 0x365   :  { %2829 = vmatprep.subr.bf16.mxu0 %v3528_v4 }
 0x368   :  { %2831 = vmatpush1.bf16.msra.mxu0 %v3536_v7 }
 0x369   :  { %2849 = vmatprep.subr.bf16.mxu0 %v3474_v50 }
 0x42e   :  { %v555_v18 = vpop.f32.mrb[2].mxu0 }
 0x42f   :  { %v562_v21 = vrot.slane %v555_v18, 6  ;;  %v557_v22 = vpop.f32.mrb[3].mxu0 }
 0x430   :  { %v563_v26 = vrot.slane %v557_v22, 6 }
 0x431   :  { %v566_v24 = vadd.f32 %v562_v21, %v3606_v51 }
 0x432   :  { %v567_v27 = vadd.f32 %v563_v26, %v3610_v54 }
 0x433   :  { %v2561_v25 = vmul.f32 -1.442695, %v566_v24 }
 0x434   :  { %v2562_v35 = vmul.f32 -1.442695, %v567_v27 }
 0x435   :  { %3100 = vpow2.f32 %v2561_v25 }
 0x436   :  { %3102 = vtanh.f32 %v567_v27 }
 0x43f   :  { %v3101_v28 = vpop.eup %3100 }
 0x440   :  { %v574_v29 = vadd.f32 1.0, %v3101_v28  ;;  %v3103_v30 = vpop.eup %3102 }
 0x442   :  { %3104 = vrcp.f32 %v574_v29 }
 0x443   :  { %3106 = vpow2.f32 %v2562_v35 }
 0x44c   :  { %v3105_v32 = vpop.eup %3104 }
 0x44d   :  { %v585_v33 = vmul.f32 %v3105_v32, %v3103_v30  ;;  %v584_v34 = vmul.f32 %v3105_v32, %v582_v31  ;;  %v3107_v36 = vpop.eup %3106 }
 0x44e   :  { %v575_v40 = vadd.f32 1.0, %v3107_v36 }
 0x44f   :  { %587 = vrot.lane.b32.xlu0 %v585_v33, %s3307_s4 }
 0x450   :  { %3108 = vrcp.f32 %v575_v40 }
 0x45a   :  { %v3109_v44 = vpop.eup %3108 }
 0x4c1   :  { %v588_v42 = vpop.permute.xlu0 %587 }
 0x4c2   :  { %v590_v43 = vadd.f32 %v588_v42, %v584_v34 }
 0x4c4   :  { %3110 = vtanh.f32 %v590_v43  ;;  %v692_v8 = vrot.slane %v590_v43, 6 }
 0x4ce   :  { %v3111_v45 = vpop.eup %3110 }
 0x4cf   :  { %v592_v46 = vmul.f32 %v3111_v45, %v3109_v44 }
 0x4d1   :  { %v594_v48 = vrot.slane %v592_v46, 2  ;;  %v1247_v21 = vsel %vm1246_vm4, %v3617_v16, %v592_v46 }
 0x4d3   :  { %595 = vrot.lane.b32.xlu1 %v594_v48, %s3307_s4 }
 0x545   :  { %v596_v49 = vpop.permute.xlu1 %595 }
 0x546   :  { %2563 = vmatmul.mubr.msk.f32.vlgmr.msra.gmra.mrb[10].mxu1 %vm385_vm3, %v596_v49 }
 0x547   :  { %2835 = vmatpush1.bf16.msra.mxu1 %v3482_v53  ;;  %883 = vmatprep.mubr.f32.mxu1 %v3306_v47 }
 0x548   :  { %2837 = vmatprep.subr.bf16.mxu1 %v3492_v56 }
 0x54b   :  { %2839 = vmatpush1.bf16.msra.mxu1 %v3500_v59 }
 0x54c   :  { %2841 = vmatprep.subr.bf16.mxu1 %v3510_v62 }
 0x54f   :  { %2843 = vmatpush1.bf16.msra.mxu1 %v3518_v1 }
 0x550   :  { %2845 = vmatprep.subr.bf16.mxu1 %v3528_v4 }
 0x553   :  { %2847 = vmatpush1.bf16.msra.mxu1 %v3536_v7 }
 0x554   :  { %2865 = vmatprep.subr.bf16.mxu1 %v3474_v50 }
 0x619   :  { %v665_v57 = vpop.f32.mrb[10].mxu1 }
 0x61a   :  { %v672_v58 = vrot.slane %v665_v57, 4  ;;  %v667_v60 = vpop.f32.mrb[11].mxu1 }
 0x61b   :  { %v673_v0 = vrot.slane %v667_v60, 4 }
 0x61c   :  { %v676_v61 = vadd.f32 %v672_v58, %v3608_v52 }
 0x61d   :  { %v677_v2 = vadd.f32 %v673_v0, %v3612_v55 }
 0x61e   :  { %v2564_v63 = vmul.f32 -1.442695, %v676_v61 }
 0x61f   :  { %v2565_v12 = vmul.f32 -1.442695, %v677_v2 }
 0x620   :  { %3112 = vpow2.f32 %v2564_v63 }
 0x621   :  { %3114 = vtanh.f32 %v677_v2 }
 0x62a   :  { %v3113_v3 = vpop.eup %3112 }
 0x62b   :  { %v684_v5 = vadd.f32 1.0, %v3113_v3  ;;  %v3115_v6 = vpop.eup %3114 }
 0x62d   :  { %3116 = vrcp.f32 %v684_v5 }
 0x62e   :  { %3118 = vpow2.f32 %v2565_v12 }
 0x637   :  { %v3117_v9 = vpop.eup %3116 }
 0x638   :  { %v695_v10 = vmul.f32 %v3117_v9, %v3115_v6  ;;  %v694_v11 = vmul.f32 %v3117_v9, %v692_v8  ;;  %v3119_v13 = vpop.eup %3118 }
 0x639   :  { %v685_v52 = vadd.f32 1.0, %v3119_v13 }
 0x63a   :  { %697 = vrot.lane.b32.xlu0 %v695_v10, %s3307_s4 }
 0x63b   :  { %3120 = vrcp.f32 %v685_v52 }
 0x645   :  { %v3121_v55 = vpop.eup %3120 }
 0x6ac   :  { %v698_v14 = vpop.permute.xlu0 %697 }
 0x6ad   :  { %v700_v15 = vadd.f32 %v698_v14, %v694_v11 }
 0x6af   :  { %3122 = vtanh.f32 %v700_v15  ;;  %v802_v35 = vrot.slane %v700_v15, 6 }
 0x6b9   :  { %v3123_v17 = vpop.eup %3122 }
 0x6ba   :  { %v702_v18 = vmul.f32 %v3123_v17, %v3121_v55 }
 0x6bc   :  { %v704_v22 = vrot.slane %v702_v18, 4  ;;  %v1249_v24 = vsel %vm1248_vm5, %v1247_v21, %v702_v18 }
 0x6be   :  { %705 = vrot.lane.b32.xlu1 %v704_v22, %s3307_s4 }
 0x730   :  { %v706_v25 = vpop.permute.xlu1 %705 }
 0x731   :  { %2566 = vmatmul.mubr.msk.f32.vlgmr.msra.gmra.mrb[4].mxu0 %vm385_vm3, %v706_v25 }
 0x732   :  { %2851 = vmatpush1.bf16.msra.mxu0 %v3482_v53  ;;  %986 = vmatprep.mubr.f32.mxu0 %v3306_v47 }
 0x733   :  { %2853 = vmatprep.subr.bf16.mxu0 %v3492_v56 }
 0x736   :  { %2855 = vmatpush1.bf16.msra.mxu0 %v3500_v59 }
 0x737   :  { %2857 = vmatprep.subr.bf16.mxu0 %v3510_v62 }
 0x73a   :  { %2859 = vmatpush1.bf16.msra.mxu0 %v3518_v1 }
 0x73b   :  { %2861 = vmatprep.subr.bf16.mxu0 %v3528_v4 }
 0x73e   :  { %2863 = vmatpush1.bf16.msra.mxu0 %v3536_v7 }
 0x73f   :  { %2881 = vmatprep.subr.bf16.mxu0 %v3474_v50 }
 0x804   :  { %v775_v16 = vpop.f32.mrb[4].mxu0 }
 0x805   :  { %v782_v26 = vrot.slane %v775_v16, 2  ;;  %v777_v27 = vpop.f32.mrb[5].mxu0 }
 0x806   :  { %v783_v30 = vrot.slane %v777_v27, 2 }
 0x807   :  { %v786_v28 = vadd.f32 %v782_v26, %v3606_v51 }
 0x808   :  { %v787_v31 = vadd.f32 %v783_v30, %v3610_v54 }
 0x809   :  { %v2567_v29 = vmul.f32 -1.442695, %v786_v28 }
 0x80a   :  { %v2568_v50 = vmul.f32 -1.442695, %v787_v31 }
 0x80b   :  { %3124 = vpow2.f32 %v2567_v29 }
 0x80c   :  { %3126 = vtanh.f32 %v787_v31 }
 0x815   :  { %v3125_v32 = vpop.eup %3124 }
 0x816   :  { %v794_v33 = vadd.f32 1.0, %v3125_v32  ;;  %v3127_v34 = vpop.eup %3126 }
 0x818   :  { %3128 = vrcp.f32 %v794_v33 }
 0x819   :  { %3130 = vpow2.f32 %v2568_v50 }
 0x822   :  { %v3129_v36 = vpop.eup %3128 }
 0x823   :  { %v805_v40 = vmul.f32 %v3129_v36, %v3127_v34  ;;  %v804_v42 = vmul.f32 %v3129_v36, %v802_v35  ;;  %v3131_v43 = vpop.eup %3130 }
 0x824   :  { %v795_v51 = vadd.f32 1.0, %v3131_v43 }
 0x825   :  { %807 = vrot.lane.b32.xlu0 %v805_v40, %s3307_s4 }
 0x826   :  { %3132 = vrcp.f32 %v795_v51 }
 0x830   :  { %v3133_v54 = vpop.eup %3132 }
 0x897   :  { %v808_v44 = vpop.permute.xlu0 %807 }
 0x898   :  { %v810_v45 = vadd.f32 %v808_v44, %v804_v42 }
 0x89a   :  { %3134 = vtanh.f32 %v810_v45  ;;  %v906_v8 = vrot.slane %v810_v45, 6 }
 0x8a4   :  { %v3135_v46 = vpop.eup %3134 }
 0x8a5   :  { %v812_v48 = vmul.f32 %v3135_v46, %v3133_v54 }
 0x8a7   :  { %v814_v49 = vrot.slane %v812_v48, 6  ;;  %v3666_v57 = vsel %vm1250_vm6, %v1249_v24, %v812_v48 }
 0x8a9   :  { %815 = vrot.lane.b32.xlu1 %v814_v49, %s3307_s4 }
 0x91b   :  { %v816_v58 = vpop.permute.xlu1 %815 }
 0x91c   :  { %2569 = vmatmul.mubr.msk.f32.vlgmr.msra.gmra.mrb[12].mxu1 %vm385_vm3, %v816_v58 }
 0x91d   :  { %2867 = vmatpush1.bf16.msra.mxu1 %v3482_v53  ;;  %1096 = vmatprep.mubr.f32.mxu1 %v3306_v47 }
 0x91e   :  { %2869 = vmatprep.subr.bf16.mxu1 %v3492_v56 }
 0x921   :  { %2871 = vmatpush1.bf16.msra.mxu1 %v3500_v59 }
 0x922   :  { %2873 = vmatprep.subr.bf16.mxu1 %v3510_v62 }
 0x925   :  { %2875 = vmatpush1.bf16.msra.mxu1 %v3518_v1 }
 0x926   :  { %2877 = vmatprep.subr.bf16.mxu1 %v3528_v4 }
 0x929   :  { %2879 = vmatpush1.bf16.msra.mxu1 %v3536_v7 }
 0x9ef   :  { %v885_v60 = vpop.f32.mrb[12].mxu1 }
 0x9f0   :  { %v890_v61 = vadd.f32 %v885_v60, %v3600_v38  ;;  %v887_v63 = vpop.f32.mrb[13].mxu1 }
 0x9f1   :  { %v891_v2 = vadd.f32 %v887_v63, %v3604_v41 }
 0x9f2   :  { %v2570_v0 = vmul.f32 -1.442695, %v890_v61 }
 0x9f3   :  { %v2571_v12 = vmul.f32 -1.442695, %v891_v2 }
 0x9f4   :  { %3136 = vpow2.f32 %v2570_v0 }
 0x9f5   :  { %3138 = vtanh.f32 %v891_v2  ;;  %v1258_v2 = vld [vmem:[%s4132_s6 + $0x18] sm:$0xff] }
 0x9fe   :  { %v3137_v3 = vpop.eup %3136 }
 0x9ff   :  { %v898_v5 = vadd.f32 1.0, %v3137_v3  ;;  %v3139_v6 = vpop.eup %3138 }
 0xa01   :  { %3140 = vrcp.f32 %v898_v5  ;;  %v1257_v5 = vld [vmem:[%s4132_s6 + $0x10] sm:$0xff] }
 0xa02   :  { %3142 = vpow2.f32 %v2571_v12  ;;  %v1261_v12 = vld [vmem:[%s4132_s6 + $0x30] sm:$0xff] }
 0xa0b   :  { %v3141_v9 = vpop.eup %3140 }
 0xa0c   :  { %v909_v10 = vmul.f32 %v3141_v9, %v3139_v6  ;;  %v908_v11 = vmul.f32 %v3141_v9, %v906_v8  ;;  %v3143_v13 = vpop.eup %3142  ;;  %v1260_v6 = vld [vmem:[%s4132_s6 + $0x28] sm:$0xff]  ;;  %v1262_v8 = vld [vmem:[%s4132_s6 + $0x38] sm:$0xff] }
 0xa0d   :  { %v899_v52 = vadd.f32 1.0, %v3143_v13  ;;  %v1264_v13 = vld [vmem:[%s4132_s6 + $0x48] sm:$0xff] }
 0xa0e   :  { %911 = vrot.lane.b32.xlu0 %v909_v10, %s3307_s4  ;;  %v2900_v10 = vpack.c.bf16 %v1262_v8, %v1260_v6 }
 0xa0f   :  { %3144 = vrcp.f32 %v899_v52  ;;  %v1266_v52 = vld [vmem:[%s4132_s6 + $0x58] sm:$0xff] }
 0xa19   :  { %v3145_v55 = vpop.eup %3144 }
 0xa80   :  { %v912_v14 = vpop.permute.xlu0 %911 }
 0xa81   :  { %v914_v15 = vadd.f32 %v912_v14, %v908_v11  ;;  %v1259_v11 = vld [vmem:[%s4132_s6 + $0x20] sm:$0xff] }
 0xa82   :  { %v2902_v14 = vpack.c.bf16 %v1261_v12, %v1259_v11 }
 0xa83   :  { %3146 = vtanh.f32 %v914_v15 }
 0xa8d   :  { %v3147_v17 = vpop.eup %3146 }
 0xa8e   :  { %v3681_v18 = vmul.f32 %v3147_v17, %v3145_v55  ;;  %v1373_v55 = vld [vmem:[%s4133_s7 + $0x18] sm:$0xff]  ;;  %v2904_v17 = vpack.c.bf16 %v1266_v52, %v1264_v13 }
 0xa90   :  { %918 = vrot.lane.b32.xlu1 %v3681_v18, %s3307_s4 }
 0xb02   :  { %v919_v21 = vpop.permute.xlu1 %918 }
 0xb03   :  { %2572 = vmatmul.mubr.msk.f32.vlgmr.msra.gmra.mrb[6].mxu0 %vm385_vm3, %v919_v21  ;;  %v1263_v21 = vld [vmem:[%s4132_s6 + $0x40] sm:$0xff] }
 0xb04   :  { %2883 = vmatpush1.bf16.msra.mxu0 %v3482_v53  ;;  %1206 = vmatprep.mubr.f32.mxu0 %v3306_v47 }
 0xb05   :  { %2885 = vmatprep.subr.bf16.mxu0 %v3492_v56 }
 0xb08   :  { %2887 = vmatpush1.bf16.msra.mxu0 %v3500_v59 }
 0xb09   :  { %2889 = vmatprep.subr.bf16.mxu0 %v3510_v62 }
 0xb0c   :  { %2891 = vmatpush1.bf16.msra.mxu0 %v3518_v1  ;;  %v1015_v1 = vrot.slane %v914_v15, 6  ;;  %v1371_v15 = vld [vmem:[%s4133_s7 + $0x8] sm:$0xff] }
 0xb0d   :  { %2893 = vmatprep.subr.bf16.mxu0 %v3528_v4 }
 0xb10   :  { %2895 = vmatpush1.bf16.msra.mxu0 %v3536_v7 }
 0xbd6   :  { %v988_v22 = vpop.f32.mrb[6].mxu0 }
 0xbd7   :  { %v995_v24 = vrot.slane %v988_v22, 6  ;;  %v990_v25 = vpop.f32.mrb[7].mxu0  ;;  %v1265_v22 = vld [vmem:[%s4132_s6 + $0x50] sm:$0xff] }
 0xbd8   :  { %v996_v26 = vrot.slane %v990_v25, 6  ;;  %v2906_v25 = vpack.c.bf16 %v1265_v22, %v1263_v21 }
 0xbd9   :  { %v999_v16 = vadd.f32 %v995_v24, %v3598_v37  ;;  %v2912_v24 = vpack.c.bf16 %v1373_v55, %v1371_v15 }
 0xbda   :  { %v1000_v56 = vadd.f32 %v996_v26, %v3602_v39 }
 0xbdb   :  { %v2573_v53 = vmul.f32 -1.442695, %v999_v16  ;;  %2913 = vmatprep.subr.bf16.mxu0 %v2912_v24 }
 0xbdc   :  { %v2574_v7 = vmul.f32 -1.442695, %v1000_v56 }
 0xbdd   :  { %3148 = vpow2.f32 %v2573_v53 }
 0xbde   :  { %3150 = vtanh.f32 %v1000_v56 }
 0xbe7   :  { %v3149_v27 = vpop.eup %3148 }
 0xbe8   :  { %v1007_v59 = vadd.f32 1.0, %v3149_v27  ;;  %v3151_v62 = vpop.eup %3150 }
 0xbea   :  { %3152 = vrcp.f32 %v1007_v59  ;;  %v1268_v59 = vld [vmem:[%s4132_s6 + $0x68] sm:$0xff] }
 0xbeb   :  { %3154 = vpow2.f32 %v2574_v7 }
 0xbf4   :  { %v3153_v28 = vpop.eup %3152 }
 0xbf5   :  { %v1018_v4 = vmul.f32 %v3153_v28, %v3151_v62  ;;  %v1017_v29 = vmul.f32 %v3153_v28, %v1015_v1  ;;  %v3155_v30 = vpop.eup %3154  ;;  %v1270_v62 = vld [vmem:[%s4132_s6 + $0x78] sm:$0xff]  ;;  %v1267_v28 = vld [vmem:[%s4132_s6 + $0x60] sm:$0xff] }
 0xbf6   :  { %v1008_v31 = vadd.f32 1.0, %v3155_v30  ;;  %v2908_v1 = vpack.c.bf16 %v1270_v62, %v1268_v59 }
 0xbf7   :  { %1020 = vrot.lane.b32.xlu0 %v1018_v4, %s3307_s4  ;;  %v1269_v4 = vld [vmem:[%s4132_s6 + $0x70] sm:$0xff] }
 0xbf8   :  { %3156 = vrcp.f32 %v1008_v31 }
 0xc02   :  { %v3157_v34 = vpop.eup %3156 }
 0xc69   :  { %v1021_v32 = vpop.permute.xlu0 %1020 }
 0xc6a   :  { %v1023_v33 = vadd.f32 %v1021_v32, %v1017_v29  ;;  %v2910_v29 = vpack.c.bf16 %v1269_v4, %v1267_v28  ;;  %v1497_v28 = vld [vmem:[%s4135_s9 + $0x30] sm:$0xff]  ;;  %v1500_v4 = vld [vmem:[%s4135_s9 + $0x48] sm:$0xff] }
 0xc6c   :  { %3158 = vtanh.f32 %v1023_v33  ;;  %v1125_v60 = vrot.slane %v1023_v33, 6 }
 0xc76   :  { %v3159_v35 = vpop.eup %3158 }
 0xc77   :  { %v3697_v36 = vmul.f32 %v3159_v35, %v3157_v34  ;;  %v1370_v35 = vld [vmem:[%s4133_s7] sm:$0xff] }
 0xc79   :  { %v1027_v40 = vrot.slane %v3697_v36, 2  ;;  %v1252_v32 = vsel %vm1246_vm4, %v3681_v18, %v3697_v36  ;;  %v1375_v18 = vld [vmem:[%s4133_s7 + $0x28] sm:$0xff]  ;;  %v1377_v36 = vld [vmem:[%s4133_s7 + $0x38] sm:$0xff] }
 0xc7b   :  { %1028 = vrot.lane.b32.xlu1 %v1027_v40, %s3307_s4  ;;  %v1372_v40 = vld [vmem:[%s4133_s7 + $0x10] sm:$0xff] }
 0xced   :  { %v1029_v42 = vpop.permute.xlu1 %1028 }
 0xcee   :  { %2575 = vmatmul.mubr.msk.f32.vlgmr.msra.gmra.mrb[14].mxu1 %vm385_vm3, %v1029_v42  ;;  %v2914_v42 = vpack.c.bf16 %v1372_v40, %v1370_v35 }
 0xcef   :  { %1357 = vmatprep.mubr.f32.mxu1 %v3306_v47 }
 0xdc1   :  { %v1098_v50 = vpop.f32.mrb[14].mxu1 }
 0xdc2   :  { %v1105_v43 = vrot.slane %v1098_v50, 4  ;;  %v1100_v51 = vpop.f32.mrb[15].mxu1  ;;  %v2916_v50 = vpack.c.bf16 %v1377_v36, %v1375_v18 }
 0xdc3   :  { %v1106_v54 = vrot.slane %v1100_v51, 4 }
 0xdc4   :  { %v1109_v44 = vadd.f32 %v1105_v43, %v3600_v38  ;;  %v1256_v38 = vld [vmem:[%s4132_s6 + $0x8] sm:$0xff]  ;;  %v1376_v43 = vld [vmem:[%s4133_s7 + $0x30] sm:$0xff] }
 0xdc5   :  { %v1110_v46 = vadd.f32 %v1106_v54, %v3604_v41  ;;  %v1255_v41 = vld [vmem:[%s4132_s6] sm:$0xff]  ;;  %v2896_v3 = vpack.c.bf16 %v1258_v2, %v1256_v38  ;;  %v1384_v2 = vld [vmem:[%s4133_s7 + $0x70] sm:$0xff] }
 0xdc6   :  { %v2576_v45 = vmul.f32 -1.442695, %v1109_v44  ;;  %v2898_v9 = vpack.c.bf16 %v1257_v5, %v1255_v41  ;;  %v1379_v44 = vld [vmem:[%s4133_s7 + $0x48] sm:$0xff]  ;;  %v1382_v38 = vld [vmem:[%s4133_s7 + $0x60] sm:$0xff] }
 0xdc7   :  { %2897 = vmatprep.subr.bf16.mxu1 %v2896_v3  ;;  %v2577_v16 = vmul.f32 -1.442695, %v1110_v46  ;;  %v2926_v41 = vpack.c.bf16 %v1384_v2, %v1382_v38 }
 0xdc8   :  { %3160 = vpow2.f32 %v2576_v45  ;;  %2899 = vmatpush1.bf16.msra.mxu1 %v2898_v9  ;;  %v1381_v45 = vld [vmem:[%s4133_s7 + $0x58] sm:$0xff] }
 0xdc9   :  { %3162 = vtanh.f32 %v1110_v46  ;;  %2901 = vmatprep.subr.bf16.mxu1 %v2900_v10  ;;  %v2920_v46 = vpack.c.bf16 %v1381_v45, %v1379_v44  ;;  %v1505_v44 = vld [vmem:[%s4135_s9 + $0x70] sm:$0xff] }
 0xdcc   :  { %2903 = vmatpush1.bf16.msra.mxu1 %v2902_v14 }
 0xdcd   :  { %2905 = vmatprep.subr.bf16.mxu1 %v2904_v17 }
 0xdd0   :  { %2907 = vmatpush1.bf16.msra.mxu1 %v2906_v25  ;;  %v1494_v25 = vld [vmem:[%s4135_s9 + $0x18] sm:$0xff] }
 0xdd1   :  { %2909 = vmatprep.subr.bf16.mxu1 %v2908_v1  ;;  %v1495_v1 = vld [vmem:[%s4135_s9 + $0x20] sm:$0xff] }
 0xdd2   :  { %v3161_v48 = vpop.eup %3160 }
 0xdd3   :  { %v1117_v49 = vadd.f32 1.0, %v3161_v48  ;;  %v3163_v58 = vpop.eup %3162  ;;  %v1378_v48 = vld [vmem:[%s4133_s7 + $0x40] sm:$0xff] }
 0xdd4   :  { %2911 = vmatpush1.bf16.msra.mxu1 %v2910_v29  ;;  %v1502_v29 = vld [vmem:[%s4135_s9 + $0x58] sm:$0xff] }
 0xdd5   :  { %3164 = vrcp.f32 %v1117_v49  ;;  %v1380_v49 = vld [vmem:[%s4133_s7 + $0x50] sm:$0xff] }
 0xdd6   :  { %3166 = vpow2.f32 %v2577_v16  ;;  %v1491_v16 = vld [vmem:[%s4135_s9] sm:$0xff] }
 0xddf   :  { %v3165_v61 = vpop.eup %3164 }
 0xde0   :  { %v1128_v63 = vmul.f32 %v3165_v61, %v3163_v58  ;;  %v1127_v0 = vmul.f32 %v3165_v61, %v1125_v60  ;;  %v3167_v53 = vpop.eup %3166  ;;  %v1383_v60 = vld [vmem:[%s4133_s7 + $0x68] sm:$0xff]  ;;  %v1385_v61 = vld [vmem:[%s4133_s7 + $0x78] sm:$0xff] }
 0xde1   :  { %v1118_v26 = vadd.f32 1.0, %v3167_v53 }
 0xde2   :  { %1130 = vrot.lane.b32.xlu0 %v1128_v63, %s3307_s4  ;;  %v2922_v63 = vpack.c.bf16 %v1380_v49, %v1378_v48 }
 0xde3   :  { %3168 = vrcp.f32 %v1118_v26  ;;  %v1493_v26 = vld [vmem:[%s4135_s9 + $0x10] sm:$0xff] }
 0xde4   :  { %v3852_v59 = vpack.c.bf16 %v1493_v26, %v1491_v16 }
 0xded   :  { %v3169_v7 = vpop.eup %3168 }
 0xe54   :  { %v1131_v56 = vpop.permute.xlu0 %1130 }
 0xe55   :  { %v3748_v27 = vadd.f32 %v1131_v56, %v1127_v0  ;;  %v2924_v0 = vpack.c.bf16 %v1385_v61, %v1383_v60  ;;  %v1496_v56 = vld [vmem:[%s4135_s9 + $0x28] sm:$0xff] }
 0xe57   :  { %3170 = vtanh.f32 %v3748_v27 }
 0xe61   :  { %v3171_v30 = vpop.eup %3170 }
 0xe62   :  { %v1135_v31 = vmul.f32 %v3171_v30, %v3169_v7  ;;  %v3871_v7 = vpack.c.bf16 %v1497_v28, %v1495_v1  ;;  %v3875_v30 = vpack.c.bf16 %v1502_v29, %v1500_v4 }
 0xe64   :  { %v1137_v33 = vrot.slane %v1135_v31, 4  ;;  %v3767_v34 = vsel %vm1248_vm5, %v1252_v32, %v1135_v31  ;;  %v1499_v31 = vld [vmem:[%s4135_s9 + $0x40] sm:$0xff]  ;;  %v1501_v32 = vld [vmem:[%s4135_s9 + $0x50] sm:$0xff] }
 0xe66   :  { %1138 = vrot.lane.b32.xlu1 %v1137_v33, %s3307_s4  ;;  %v3885_v33 = vpack.c.bf16 %v1501_v32, %v1499_v31 }
 0xe6a   :  { %1285 = vrot.lane.b32.xlu1 %v3666_v57, %s3307_s4  ;;  %v1374_v57 = vld [vmem:[%s4133_s7 + $0x20] sm:$0xff] }
 0xe6b   :  { %v2918_v54 = vpack.c.bf16 %v1376_v43, %v1374_v57  ;;  %v1506_v57 = vld [vmem:[%s4135_s9 + $0x78] sm:$0xff] }
 0xed8   :  { %v1139_v51 = vpop.permute.xlu1 %1138 }
 0xed9   :  { %2578 = vmatmul.mubr.msk.f32.vlgmr.msra.gmra.mrb[8].mxu0 %vm385_vm3, %v1139_v51  ;;  %v1503_v51 = vld [vmem:[%s4135_s9 + $0x60] sm:$0xff] }
 0xeda   :  { %2915 = vmatpush1.bf16.msra.mxu0 %v2914_v42  ;;  %1450 = vmatprep.mubr.f32.mxu0 %v3306_v47  ;;  %v3906_v45 = vpack.c.bf16 %v1505_v44, %v1503_v51 }
 0xedb   :  { %2917 = vmatprep.subr.bf16.mxu0 %v2916_v50  ;;  %v1504_v50 = vld [vmem:[%s4135_s9 + $0x68] sm:$0xff] }
 0xedc   :  { %v1286_v58 = vpop.permute.xlu1 %1285  ;;  %v3898_v43 = vpack.c.bf16 %v1506_v57, %v1504_v50 }
 0xedd   :  { %2581 = vmatmul.mubr.msk.f32.vlgmr.msra.gmra.mrb[16].mxu1 %vm385_vm3, %v1286_v58 }
 0xede   :  { %2919 = vmatpush1.bf16.msra.mxu0 %v2918_v54  ;;  %1363 = vmatprep.mubr.f32.mxu1 %v3306_v47 }
 0xedf   :  { %2921 = vmatprep.subr.bf16.mxu0 %v2920_v46 }
 0xee2   :  { %2923 = vmatpush1.bf16.msra.mxu0 %v2922_v63 }
 0xee3   :  { %2925 = vmatprep.subr.bf16.mxu0 %v2924_v0 }
 0xee6   :  { %2927 = vmatpush1.bf16.msra.mxu0 %v2926_v41 }
 0xee9   :  { %2583 = vmatmul.mubr.msk.f32.vlgmr.msra.gmra.mrb[10].mxu0 %vm385_vm3, %v1286_v58 }
 0xeea   :  { %1456 = vmatprep.mubr.f32.mxu0 %v3306_v47 }
 0xfac   :  { %v1208_v3 = vpop.f32.mrb[8].mxu0 }
 0xfad   :  { %v1215_v5 = vrot.slane %v1208_v3, 2  ;;  %v1210_v6 = vpop.f32.mrb[9].mxu0 }
 0xfae   :  { %v1216_v12 = vrot.slane %v1210_v6, 2 }
 0xfaf   :  { %v1219_v8 = vadd.f32 %v1215_v5, %v3598_v37  ;;  %v1235_v37 = vrot.slane %v3748_v27, 6  ;;  %v1498_v27 = vld [vmem:[%s4135_s9 + $0x38] sm:$0xff] }
 0xfb0   :  { %v3821_v9 = vpop.f32.mrb[16].mxu1  ;;  %v1220_v13 = vadd.f32 %v1216_v12, %v3602_v39  ;;  %v1492_v39 = vld [vmem:[%s4135_s9 + $0x8] sm:$0xff]  ;;  %v3854_v62 = vpack.c.bf16 %v1498_v27, %v1496_v56 }
 0xfb1   :  { %v2579_v10 = vmul.f32 -1.442695, %v1219_v8  ;;  %v3823_v11 = vpop.f32.mrb[17].mxu1  ;;  %v3841_v53 = vpack.c.bf16 %v1494_v25, %v1492_v39 }
 0xfb2   :  { %v2580_v35 = vmul.f32 -1.442695, %v1220_v13 }
 0xfb3   :  { %3172 = vpow2.f32 %v2579_v10  ;;  %2929 = vmatprep.subr.bf16.mxu1 %v3841_v53  ;;  %2945 = vmatprep.subr.bf16.mxu0 %v3841_v53 }
 0xfb4   :  { %3174 = vtanh.f32 %v1220_v13  ;;  %2931 = vmatpush1.bf16.msra.mxu1 %v3852_v59  ;;  %2947 = vmatpush1.bf16.msra.mxu0 %v3852_v59 }
 0xfb5   :  { %2933 = vmatprep.subr.bf16.mxu1 %v3854_v62  ;;  %2949 = vmatprep.subr.bf16.mxu0 %v3854_v62 }
 0xfb8   :  { %2935 = vmatpush1.bf16.msra.mxu1 %v3871_v7  ;;  %2951 = vmatpush1.bf16.msra.mxu0 %v3871_v7 }
 0xfb9   :  { %2937 = vmatprep.subr.bf16.mxu1 %v3875_v30  ;;  %2953 = vmatprep.subr.bf16.mxu0 %v3875_v30 }
 0xfbc   :  { %v3826_v52 = vpop.f32.mrb[10].mxu0  ;;  %2939 = vmatpush1.bf16.msra.mxu1 %v3885_v33  ;;  %2955 = vmatpush1.bf16.msra.mxu0 %v3885_v33 }
 0xfbd   :  { %v3173_v14 = vpop.eup %3172  ;;  %v3828_v15 = vpop.f32.mrb[11].mxu0  ;;  %2941 = vmatprep.subr.bf16.mxu1 %v3898_v43  ;;  %2957 = vmatprep.subr.bf16.mxu0 %v3898_v43  ;;  %v1479_v38 = vrot.slane %v3826_v52, 6  ;;  %v1485_v2 = vrot.slane %v3826_v52, 2 }
 0xfbe   :  { %v1227_v55 = vadd.f32 1.0, %v3173_v14  ;;  %v3175_v17 = vpop.eup %3174  ;;  %v1480_v5 = vrot.slane %v3828_v15, 6  ;;  %v1486_v19 = vrot.slane %v3828_v15, 2 }
 0xfc0   :  { %3176 = vrcp.f32 %v1227_v55  ;;  %2943 = vmatpush1.bf16.msra.mxu1 %v3906_v45  ;;  %2959 = vmatpush1.bf16.msra.mxu0 %v3906_v45 }
 0xfc1   :  { %3178 = vpow2.f32 %v2580_v35  ;;  %2961 = vmatprep.subr.bf16.mxu1 %v3841_v53  ;;  %2977 = vmatprep.subr.bf16.mxu0 %v3841_v53 }
 0xfca   :  { %v3177_v21 = vpop.eup %3176 }
 0xfcb   :  { %v1238_v22 = vmul.f32 %v3177_v21, %v3175_v17  ;;  %v1237_v24 = vmul.f32 %v3177_v21, %v1235_v37  ;;  %v3179_v40 = vpop.eup %3178 }
 0xfcc   :  { %v1228_v18 = vadd.f32 1.0, %v3179_v40 }
 0xfcd   :  { %1240 = vrot.lane.b32.xlu0 %v1238_v22, %s3307_s4 }
 0xfce   :  { %3180 = vrcp.f32 %v1228_v18 }
 0xfd8   :  { %v3181_v54 = vpop.eup %3180 }
0x103f   :  { %v1241_v36 = vpop.permute.xlu0 %1240 }
0x1040   :  { %v1243_v42 = vadd.f32 %v1241_v36, %v1237_v24 }
0x1042   :  { %3182 = vtanh.f32 %v1243_v42 }
0x104c   :  { %v3183_v46 = vpop.eup %3182 }
0x104d   :  { %v1245_v48 = vmul.f32 %v3183_v46, %v3181_v54 }
0x104f   :  { %v1254_v49 = vsel %vm1250_vm6, %v3767_v34, %v1245_v48  ;;  %v1271_v34 = vld [vmem:[%s4134_s8] sm:$0x3] }
0x1050   :  { %1287 = vrot.lane.b32.xlu0 %v1254_v49, %s3307_s4  ;;  %v1276_v60 = vrot.slane %v1271_v34, %v164_v20  ;;  %v1280_v61 = vrot.slane %v1271_v34, %v168_v23 }
0x1052   :  { %v1360_v63 = vadd.f32 %v3821_v9, %v1276_v60  ;;  %v1362_v0 = vadd.f32 %v3823_v11, %v1280_v61 }
0x10c2   :  { %v1288_v58 = vpop.permute.xlu0 %1287 }
0x10c3   :  { %2582 = vmatmul.mubr.msk.f32.gmra.mrb[18].mxu1 %vm385_vm3, %v1288_v58  ;;  %2584 = vmatmul.mubr.msk.f32.gmra.mrb[12].mxu0 %vm385_vm3, %v1288_v58 }
0x10c4   :  { %1571 = vmatprep.mubr.f32.mxu1 %v3306_v47  ;;  %1671 = vmatprep.mubr.f32.mxu0 %v3306_v47 }
0x10c7   :  { %1572 = vmatmul.mubr.f32.vlgmr.msra.gmra.mrb[20].mxu1 %v3306_v47 }
0x10c8   :  { %2963 = vmatpush1.bf16.msra.mxu1 %v3852_v59  ;;  %1781 = vmatprep.mubr.f32.mxu1 %v3306_v47 }
0x10c9   :  { %2965 = vmatprep.subr.bf16.mxu1 %v3854_v62 }
0x10cc   :  { %2967 = vmatpush1.bf16.msra.mxu1 %v3871_v7 }
0x10cd   :  { %2969 = vmatprep.subr.bf16.mxu1 %v3875_v30 }
0x10d0   :  { %2971 = vmatpush1.bf16.msra.mxu1 %v3885_v33 }
0x10d1   :  { %2973 = vmatprep.subr.bf16.mxu1 %v3898_v43 }
0x10d4   :  { %2975 = vmatpush1.bf16.msra.mxu1 %v3906_v45 }
0x10d5   :  { %2993 = vmatprep.subr.bf16.mxu1 %v3841_v53 }
0x1196   :  { %v1365_v41 = vpop.f32.mrb[18].mxu1  ;;  %v1458_v3 = vpop.f32.mrb[12].mxu0 }
0x1197   :  { %v1366_v6 = vadd.f32 %v1365_v41, %v1276_v60  ;;  %v1465_v8 = vrot.slane %v1458_v3, 6  ;;  %v1471_v10 = vrot.slane %v1458_v3, 2  ;;  %v1367_v12 = vpop.f32.mrb[19].mxu1  ;;  %v1460_v20 = vpop.f32.mrb[13].mxu0 }
0x1198   :  { %v1368_v23 = vadd.f32 %v1367_v12, %v1280_v61  ;;  %v1466_v13 = vrot.slane %v1460_v20, 6  ;;  %v1472_v9 = vrot.slane %v1460_v20, 2 }
0x1199   :  { %v3944_v14 = vadd.f32 %v1485_v2, %v1366_v6  ;;  %v3946_v11 = vadd.f32 %v1471_v10, %v1360_v63  ;;  %v3948_v55 = vadd.f32 %v1465_v8, %v1360_v63  ;;  %v3950_v52 = vadd.f32 %v1479_v38, %v1366_v6 }
0x119a   :  { %v3952_v17 = vadd.f32 %v1486_v19, %v1368_v23  ;;  %v3954_v37 = vadd.f32 %v1472_v9, %v1362_v0  ;;  %v1573_v21 = vpop.f32.mrb[20].mxu1  ;;  %v3956_v22 = vadd.f32 %v1466_v13, %v1362_v0  ;;  %v3958_v24 = vadd.f32 %v1480_v5, %v1368_v23 }
0x119b   :  { %v1578_v15 = vadd.f32 %v1573_v21, %v3948_v55  ;;  %v1575_v39 = vpop.f32.mrb[21].mxu1 }
0x119c   :  { %v1579_v16 = vadd.f32 %v1575_v39, %v3956_v22 }
0x119d   :  { %v2585_v25 = vmul.f32 -1.442695, %v1578_v15 }
0x119e   :  { %v2586_v4 = vmul.f32 -1.442695, %v1579_v16 }
0x119f   :  { %3184 = vpow2.f32 %v2585_v25 }
0x11a0   :  { %3186 = vtanh.f32 %v1579_v16 }
0x11a9   :  { %v3185_v26 = vpop.eup %3184 }
0x11aa   :  { %v1586_v56 = vadd.f32 1.0, %v3185_v26  ;;  %v3187_v27 = vpop.eup %3186 }
0x11ac   :  { %3188 = vrcp.f32 %v1586_v56 }
0x11ad   :  { %3190 = vpow2.f32 %v2586_v4 }
0x11b6   :  { %v3189_v1 = vpop.eup %3188 }
0x11b7   :  { %v1594_v28 = vmul.f32 %v3189_v1, %v3187_v27  ;;  %v3191_v29 = vpop.eup %3190  ;;  %v1593_v32 = vmul.f32 0.0, %v3189_v1 }
0x11b8   :  { %v1587_v31 = vadd.f32 1.0, %v3191_v29 }
0x11b9   :  { %1596 = vrot.lane.b32.xlu1 %v1594_v28, %s3307_s4 }
0x11ba   :  { %3192 = vrcp.f32 %v1587_v31 }
0x11c4   :  { %v3193_v18 = vpop.eup %3192 }
0x122b   :  { %v1597_v35 = vpop.permute.xlu1 %1596 }
0x122c   :  { %v1599_v40 = vadd.f32 %v1597_v35, %v1593_v32 }
0x122e   :  { %3194 = vtanh.f32 %v1599_v40  ;;  %v1700_v61 = vrot.slane %v1599_v40, 6 }
0x1238   :  { %v3195_v36 = vpop.eup %3194 }
0x1239   :  { %v1601_v42 = vmul.f32 %v3195_v36, %v3193_v18 }
0x123b   :  { %1603 = vrot.lane.b32.xlu0 %v1601_v42, %s3307_s4 }
0x12ad   :  { %v3964_v50 = vpop.permute.xlu0 %1603 }
0x12ae   :  { %2587 = vmatmul.mubr.msk.f32.vlgmr.msra.gmra.mrb[14].mxu0 %vm385_vm3, %v3964_v50 }
0x12af   :  { %2979 = vmatpush1.bf16.msra.mxu0 %v3852_v59  ;;  %1891 = vmatprep.mubr.f32.mxu0 %v3306_v47 }
0x12b0   :  { %2981 = vmatprep.subr.bf16.mxu0 %v3854_v62 }
0x12b3   :  { %2983 = vmatpush1.bf16.msra.mxu0 %v3871_v7 }
0x12b4   :  { %2985 = vmatprep.subr.bf16.mxu0 %v3875_v30 }
0x12b7   :  { %2987 = vmatpush1.bf16.msra.mxu0 %v3885_v33 }
0x12b8   :  { %2989 = vmatprep.subr.bf16.mxu0 %v3898_v43 }
0x12bb   :  { %2991 = vmatpush1.bf16.msra.mxu0 %v3906_v45 }
0x12bc   :  { %3009 = vmatprep.subr.bf16.mxu0 %v3841_v53 }
0x1381   :  { %v1673_v57 = vpop.f32.mrb[14].mxu0 }
0x1382   :  { %v1680_v51 = vrot.slane %v1673_v57, 6  ;;  %v1675_v44 = vpop.f32.mrb[15].mxu0 }
0x1383   :  { %v1681_v48 = vrot.slane %v1675_v44, 6 }
0x1384   :  { %v1684_v54 = vadd.f32 %v1680_v51, %v3946_v11 }
0x1385   :  { %v1685_v49 = vadd.f32 %v1681_v48, %v3954_v37 }
0x1386   :  { %v2588_v46 = vmul.f32 -1.442695, %v1684_v54 }
0x1387   :  { %v2589_v2 = vmul.f32 -1.442695, %v1685_v49 }
0x1388   :  { %3196 = vpow2.f32 %v2588_v46 }
0x1389   :  { %3198 = vtanh.f32 %v1685_v49 }
0x1392   :  { %v3197_v58 = vpop.eup %3196 }
0x1393   :  { %v1692_v34 = vadd.f32 1.0, %v3197_v58  ;;  %v3199_v60 = vpop.eup %3198 }
0x1395   :  { %3200 = vrcp.f32 %v1692_v34 }
0x1396   :  { %3202 = vpow2.f32 %v2589_v2 }
0x139f   :  { %v3201_v63 = vpop.eup %3200 }
0x13a0   :  { %v1703_v0 = vmul.f32 %v3201_v63, %v3199_v60  ;;  %v1702_v38 = vmul.f32 %v3201_v63, %v1700_v61  ;;  %v3203_v41 = vpop.eup %3202 }
0x13a1   :  { %v1693_v3 = vadd.f32 1.0, %v3203_v41 }
0x13a2   :  { %1705 = vrot.lane.b32.xlu1 %v1703_v0, %s3307_s4 }
0x13a3   :  { %3204 = vrcp.f32 %v1693_v3 }
0x13ad   :  { %v3205_v8 = vpop.eup %3204 }
0x1414   :  { %v1706_v5 = vpop.permute.xlu1 %1705 }
0x1415   :  { %v1708_v6 = vadd.f32 %v1706_v5, %v1702_v38 }
0x1417   :  { %3206 = vtanh.f32 %v1708_v6  ;;  %v1810_v27 = vrot.slane %v1708_v6, 6 }
0x1421   :  { %v3207_v10 = vpop.eup %3206 }
0x1422   :  { %v1710_v12 = vmul.f32 %v3207_v10, %v3205_v8 }
0x1424   :  { %v1712_v20 = vrot.slane %v1710_v12, 2 }
0x1426   :  { %1713 = vrot.lane.b32.xlu0 %v1712_v20, %s3307_s4 }
0x1498   :  { %v1714_v19 = vpop.permute.xlu0 %1713 }
0x1499   :  { %2590 = vmatmul.mubr.msk.f32.vlgmr.msra.gmra.mrb[22].mxu1 %vm385_vm3, %v1714_v19 }
0x149a   :  { %2995 = vmatpush1.bf16.msra.mxu1 %v3852_v59  ;;  %2001 = vmatprep.mubr.f32.mxu1 %v3306_v47 }
0x149b   :  { %2997 = vmatprep.subr.bf16.mxu1 %v3854_v62 }
0x149e   :  { %2999 = vmatpush1.bf16.msra.mxu1 %v3871_v7 }
0x149f   :  { %3001 = vmatprep.subr.bf16.mxu1 %v3875_v30 }
0x14a2   :  { %3003 = vmatpush1.bf16.msra.mxu1 %v3885_v33 }
0x14a3   :  { %3005 = vmatprep.subr.bf16.mxu1 %v3898_v43 }
0x14a6   :  { %3007 = vmatpush1.bf16.msra.mxu1 %v3906_v45 }
0x14a7   :  { %3025 = vmatprep.subr.bf16.mxu1 %v3841_v53 }
0x156c   :  { %v1783_v23 = vpop.f32.mrb[22].mxu1 }
0x156d   :  { %v1790_v13 = vrot.slane %v1783_v23, 4  ;;  %v1785_v9 = vpop.f32.mrb[23].mxu1 }
0x156e   :  { %v1791_v39 = vrot.slane %v1785_v9, 4 }
0x156f   :  { %v1794_v21 = vadd.f32 %v1790_v13, %v3948_v55 }
0x1570   :  { %v1795_v25 = vadd.f32 %v1791_v39, %v3956_v22 }
0x1571   :  { %v2591_v15 = vmul.f32 -1.442695, %v1794_v21 }
0x1572   :  { %v2592_v29 = vmul.f32 -1.442695, %v1795_v25 }
0x1573   :  { %3208 = vpow2.f32 %v2591_v15 }
0x1574   :  { %3210 = vtanh.f32 %v1795_v25 }
0x157d   :  { %v3209_v16 = vpop.eup %3208 }
0x157e   :  { %v1802_v26 = vadd.f32 1.0, %v3209_v16  ;;  %v3211_v56 = vpop.eup %3210 }
0x1580   :  { %3212 = vrcp.f32 %v1802_v26 }
0x1581   :  { %3214 = vpow2.f32 %v2592_v29 }
0x158a   :  { %v3213_v1 = vpop.eup %3212 }
0x158b   :  { %v1813_v28 = vmul.f32 %v3213_v1, %v3211_v56  ;;  %v1812_v4 = vmul.f32 %v3213_v1, %v1810_v27  ;;  %v3215_v31 = vpop.eup %3214 }
0x158c   :  { %v1803_v55 = vadd.f32 1.0, %v3215_v31 }
0x158d   :  { %1815 = vrot.lane.b32.xlu1 %v1813_v28, %s3307_s4 }
0x158e   :  { %3216 = vrcp.f32 %v1803_v55 }
0x1598   :  { %v3217_v22 = vpop.eup %3216 }
0x15ff   :  { %v1816_v32 = vpop.permute.xlu1 %1815 }
0x1600   :  { %v1818_v35 = vadd.f32 %v1816_v32, %v1812_v4 }
0x1602   :  { %3218 = vtanh.f32 %v1818_v35  ;;  %v1920_v61 = vrot.slane %v1818_v35, 6 }
0x160c   :  { %v3219_v40 = vpop.eup %3218 }
0x160d   :  { %v1820_v18 = vmul.f32 %v3219_v40, %v3217_v22 }
0x160f   :  { %v1822_v36 = vrot.slane %v1820_v18, 4 }
0x1611   :  { %1823 = vrot.lane.b32.xlu0 %v1822_v36, %s3307_s4 }
0x1683   :  { %v1824_v42 = vpop.permute.xlu0 %1823 }
0x1684   :  { %2593 = vmatmul.mubr.msk.f32.vlgmr.msra.gmra.mrb[16].mxu0 %vm385_vm3, %v1824_v42 }
0x1685   :  { %3011 = vmatpush1.bf16.msra.mxu0 %v3852_v59  ;;  %2104 = vmatprep.mubr.f32.mxu0 %v3306_v47 }
0x1686   :  { %3013 = vmatprep.subr.bf16.mxu0 %v3854_v62 }
0x1689   :  { %3015 = vmatpush1.bf16.msra.mxu0 %v3871_v7 }
0x168a   :  { %3017 = vmatprep.subr.bf16.mxu0 %v3875_v30 }
0x168d   :  { %3019 = vmatpush1.bf16.msra.mxu0 %v3885_v33 }
0x168e   :  { %3021 = vmatprep.subr.bf16.mxu0 %v3898_v43 }
0x1691   :  { %3023 = vmatpush1.bf16.msra.mxu0 %v3906_v45 }
0x1692   :  { %3041 = vmatprep.subr.bf16.mxu0 %v3841_v53 }
0x1757   :  { %v1893_v57 = vpop.f32.mrb[16].mxu0 }
0x1758   :  { %v1900_v51 = vrot.slane %v1893_v57, 2  ;;  %v1895_v44 = vpop.f32.mrb[17].mxu0 }
0x1759   :  { %v1901_v48 = vrot.slane %v1895_v44, 2 }
0x175a   :  { %v1904_v54 = vadd.f32 %v1900_v51, %v3946_v11 }
0x175b   :  { %v1905_v49 = vadd.f32 %v1901_v48, %v3954_v37 }
0x175c   :  { %v2594_v46 = vmul.f32 -1.442695, %v1904_v54 }
0x175d   :  { %v2595_v53 = vmul.f32 -1.442695, %v1905_v49 }
0x175e   :  { %3220 = vpow2.f32 %v2594_v46 }
0x175f   :  { %3222 = vtanh.f32 %v1905_v49 }
0x1768   :  { %v3221_v58 = vpop.eup %3220 }
0x1769   :  { %v1912_v34 = vadd.f32 1.0, %v3221_v58  ;;  %v3223_v60 = vpop.eup %3222 }
0x176b   :  { %3224 = vrcp.f32 %v1912_v34 }
0x176c   :  { %3226 = vpow2.f32 %v2595_v53  ;;  %v2374_v53 = vld [vmem:[%s4137_s11 + $0x10] sm:$0xff] }
0x1775   :  { %v3225_v63 = vpop.eup %3224 }
0x1776   :  { %v1923_v0 = vmul.f32 %v3225_v63, %v3223_v60  ;;  %v1922_v38 = vmul.f32 %v3225_v63, %v1920_v61  ;;  %v3227_v2 = vpop.eup %3226  ;;  %v2372_v63 = vld [vmem:[%s4137_s11] sm:$0xff] }
0x1777   :  { %v1913_v11 = vadd.f32 1.0, %v3227_v2  ;;  %v2375_v2 = vld [vmem:[%s4137_s11 + $0x18] sm:$0xff] }
0x1778   :  { %1925 = vrot.lane.b32.xlu1 %v1923_v0, %s3307_s4  ;;  %v2373_v0 = vld [vmem:[%s4137_s11 + $0x8] sm:$0xff] }
0x1779   :  { %3228 = vrcp.f32 %v1913_v11 }
0x1783   :  { %v3229_v37 = vpop.eup %3228 }
0x17ea   :  { %v1926_v41 = vpop.permute.xlu1 %1925 }
0x17eb   :  { %v1928_v3 = vadd.f32 %v1926_v41, %v1922_v38  ;;  %v3057_v38 = vpack.c.bf16 %v2373_v0, %v2372_v63  ;;  %v3060_v41 = vpack.c.bf16 %v2375_v2, %v2374_v53  ;;  %v2371_v63 = vld [vmem:[%s4136_s10 + $0x38] sm:$0xff] }
0x17ed   :  { %3230 = vtanh.f32 %v1928_v3  ;;  %v2024_v39 = vrot.slane %v1928_v3, 6  ;;  %v2376_v3 = vld [vmem:[%s4137_s11 + $0x20] sm:$0xff] }
0x17f7   :  { %v3231_v5 = vpop.eup %3230 }
0x17f8   :  { %v1930_v6 = vmul.f32 %v3231_v5, %v3229_v37  ;;  %v2377_v37 = vld [vmem:[%s4137_s11 + $0x28] sm:$0xff] }
0x17f9   :  { %v3063_v5 = vpack.c.bf16 %v2377_v37, %v2376_v3 }
0x17fa   :  { %v1932_v8 = vrot.slane %v1930_v6, 6  ;;  %v2378_v6 = vld [vmem:[%s4137_s11 + $0x30] sm:$0xff] }
0x17fc   :  { %1933 = vrot.lane.b32.xlu0 %v1932_v8, %s3307_s4  ;;  %v2379_v8 = vld [vmem:[%s4137_s11 + $0x38] sm:$0xff] }
0x186e   :  { %v1934_v10 = vpop.permute.xlu0 %1933 }
0x186f   :  { %2596 = vmatmul.mubr.msk.f32.vlgmr.msra.gmra.mrb[24].mxu1 %vm385_vm3, %v1934_v10  ;;  %v3066_v10 = vpack.c.bf16 %v2379_v8, %v2378_v6 }
0x1870   :  { %3027 = vmatpush1.bf16.msra.mxu1 %v3852_v59  ;;  %2214 = vmatprep.mubr.f32.mxu1 %v3306_v47 }
0x1871   :  { %3029 = vmatprep.subr.bf16.mxu1 %v3854_v62 }
0x1874   :  { %3031 = vmatpush1.bf16.msra.mxu1 %v3871_v7 }
0x1875   :  { %3033 = vmatprep.subr.bf16.mxu1 %v3875_v30 }
0x1878   :  { %3035 = vmatpush1.bf16.msra.mxu1 %v3885_v33 }
0x1879   :  { %3037 = vmatprep.subr.bf16.mxu1 %v3898_v43 }
0x187c   :  { %3039 = vmatpush1.bf16.msra.mxu1 %v3906_v45 }
0x1942   :  { %v2003_v12 = vpop.f32.mrb[24].mxu1 }
0x1943   :  { %v2008_v20 = vadd.f32 %v2003_v12, %v3950_v52  ;;  %v2005_v19 = vpop.f32.mrb[25].mxu1 }
0x1944   :  { %v2009_v13 = vadd.f32 %v2005_v19, %v3958_v24 }
0x1945   :  { %v2597_v23 = vmul.f32 -1.442695, %v2008_v20 }
0x1946   :  { %v2598_v56 = vmul.f32 -1.442695, %v2009_v13 }
0x1947   :  { %3232 = vpow2.f32 %v2597_v23 }
0x1948   :  { %3234 = vtanh.f32 %v2009_v13 }
0x1951   :  { %v3233_v9 = vpop.eup %3232 }
0x1952   :  { %v2016_v21 = vadd.f32 1.0, %v3233_v9  ;;  %v3235_v15 = vpop.eup %3234 }
0x1954   :  { %3236 = vrcp.f32 %v2016_v21 }
0x1955   :  { %3238 = vpow2.f32 %v2598_v56 }
0x195e   :  { %v3237_v25 = vpop.eup %3236 }
0x195f   :  { %v2027_v16 = vmul.f32 %v3237_v25, %v3235_v15  ;;  %v2026_v26 = vmul.f32 %v3237_v25, %v2024_v39  ;;  %v3239_v27 = vpop.eup %3238 }
0x1960   :  { %v2017_v1 = vadd.f32 1.0, %v3239_v27 }
0x1961   :  { %2029 = vrot.lane.b32.xlu1 %v2027_v16, %s3307_s4 }
0x1962   :  { %3240 = vrcp.f32 %v2017_v1 }
0x196c   :  { %v3241_v29 = vpop.eup %3240 }
0x19d3   :  { %v2030_v28 = vpop.permute.xlu1 %2029 }
0x19d4   :  { %v2032_v4 = vadd.f32 %v2030_v28, %v2026_v26 }
0x19d6   :  { %3242 = vtanh.f32 %v2032_v4 }
0x19e0   :  { %v3243_v31 = vpop.eup %3242 }
0x19e1   :  { %v2034_v55 = vmul.f32 %v3243_v31, %v3241_v29 }
0x19e3   :  { %2036 = vrot.lane.b32.xlu0 %v2034_v55, %s3307_s4 }
0x1a55   :  { %v2037_v32 = vpop.permute.xlu0 %2036 }
0x1a56   :  { %2599 = vmatmul.mubr.msk.f32.vlgmr.msra.gmra.mrb[18].mxu0 %vm385_vm3, %v2037_v32 }
0x1a57   :  { %3043 = vmatpush1.bf16.msra.mxu0 %v3852_v59  ;;  %2324 = vmatprep.mubr.f32.mxu0 %v3306_v47 }
0x1a58   :  { %3045 = vmatprep.subr.bf16.mxu0 %v3854_v62 }
0x1a5b   :  { %3047 = vmatpush1.bf16.msra.mxu0 %v3871_v7 }
0x1a5c   :  { %3049 = vmatprep.subr.bf16.mxu0 %v3875_v30 }
0x1a5f   :  { %3051 = vmatpush1.bf16.msra.mxu0 %v3885_v33  ;;  %v2133_v33 = vrot.slane %v2032_v4, 6 }
0x1a60   :  { %3053 = vmatprep.subr.bf16.mxu0 %v3898_v43 }
0x1a63   :  { %3055 = vmatpush1.bf16.msra.mxu0 %v3906_v45  ;;  %v3308_v45 = vmov 0.0|0.0  }
0x1a64   :  { %3056 = vmatprep.subr.bf16.mxu1 %v3308_v45  ;;  %3068 = vmatprep.subr.bf16.mxu0 %v3308_v45 }
0x1b29   :  { %v2106_v35 = vpop.f32.mrb[18].mxu0 }
0x1b2a   :  { %v2113_v22 = vrot.slane %v2106_v35, 6  ;;  %v2108_v40 = vpop.f32.mrb[19].mxu0 }
0x1b2b   :  { %v2114_v36 = vrot.slane %v2108_v40, 6 }
0x1b2c   :  { %v2117_v18 = vadd.f32 %v2113_v22, %v3944_v14 }
0x1b2d   :  { %v2118_v62 = vadd.f32 %v2114_v36, %v3952_v17 }
0x1b2e   :  { %v2600_v59 = vmul.f32 -1.442695, %v2117_v18 }
0x1b2f   :  { %v2601_v44 = vmul.f32 -1.442695, %v2118_v62 }
0x1b30   :  { %3244 = vpow2.f32 %v2600_v59 }
0x1b31   :  { %3246 = vtanh.f32 %v2118_v62 }
0x1b3a   :  { %v3245_v42 = vpop.eup %3244 }
0x1b3b   :  { %v2125_v7 = vadd.f32 1.0, %v3245_v42  ;;  %v3247_v30 = vpop.eup %3246 }
0x1b3d   :  { %3248 = vrcp.f32 %v2125_v7 }
0x1b3e   :  { %3250 = vpow2.f32 %v2601_v44 }
0x1b47   :  { %v3249_v57 = vpop.eup %3248 }
0x1b48   :  { %v2136_v43 = vmul.f32 %v3249_v57, %v3247_v30  ;;  %v2135_v51 = vmul.f32 %v3249_v57, %v2133_v33  ;;  %v3251_v54 = vpop.eup %3250 }
0x1b49   :  { %v2126_v46 = vadd.f32 1.0, %v3251_v54 }
0x1b4a   :  { %2138 = vrot.lane.b32.xlu1 %v2136_v43, %s3307_s4 }
0x1b4b   :  { %3252 = vrcp.f32 %v2126_v46 }
0x1b55   :  { %v3253_v58 = vpop.eup %3252 }
0x1bbc   :  { %v2139_v48 = vpop.permute.xlu1 %2138 }
0x1bbd   :  { %v2141_v49 = vadd.f32 %v2139_v48, %v2135_v51  ;;  %v2367_v48 = vld [vmem:[%s4136_s10 + $0x18] sm:$0xff] }
0x1bbf   :  { %3254 = vtanh.f32 %v2141_v49  ;;  %v2243_v56 = vrot.slane %v2141_v49, 6 }
0x1bc9   :  { %v3255_v34 = vpop.eup %3254 }
0x1bca   :  { %v2143_v60 = vmul.f32 %v3255_v34, %v3253_v58  ;;  %v2368_v58 = vld [vmem:[%s4136_s10 + $0x20] sm:$0xff]  ;;  %v2369_v34 = vld [vmem:[%s4136_s10 + $0x28] sm:$0xff] }
0x1bcc   :  { %v2145_v61 = vrot.slane %v2143_v60, 2  ;;  %v3075_v60 = vpack.c.bf16 %v2369_v34, %v2368_v58 }
0x1bce   :  { %2146 = vrot.lane.b32.xlu0 %v2145_v61, %s3307_s4  ;;  %v2370_v61 = vld [vmem:[%s4136_s10 + $0x30] sm:$0xff] }
0x1bcf   :  { %v3078_v0 = vpack.c.bf16 %v2371_v63, %v2370_v61 }
0x1c40   :  { %v2147_v11 = vpop.permute.xlu0 %2146 }
0x1c41   :  { %2602 = vmatmul.mubr.msk.f32.vlgmr.msra.gmra.mrb[26].mxu1 %vm385_vm3, %v2147_v11 }
0x1c42   :  { %3058 = vmatpush3.bf16.msra.mxu1 %v3057_v38  ;;  %2698 = vmatprep.mubr.msk.f32.mxu1 %vm3309_vm7, %v3306_v47 }
0x1c43   :  { %3059 = vmatprep.subr.bf16.mxu1 %v3308_v45 }
0x1c46   :  { %3061 = vmatpush3.bf16.msra.mxu1 %v3060_v41 }
0x1c47   :  { %3062 = vmatprep.subr.bf16.mxu1 %v3308_v45 }
0x1c4a   :  { %3064 = vmatpush3.bf16.msra.mxu1 %v3063_v5 }
0x1c4b   :  { %3065 = vmatprep.subr.bf16.mxu1 %v3308_v45 }
0x1c4e   :  { %3067 = vmatpush3.bf16.msra.mxu1 %v3066_v10 }
0x1c51   :  { %2699 = vmatmul.mubr.msk.f32.vlgmr.msra.gmra.mrb[28].mxu1 %vm385_vm3, %v3964_v50 }
0x1d14   :  { %v2216_v12 = vpop.f32.mrb[26].mxu1 }
0x1d15   :  { %v2223_v20 = vrot.slane %v2216_v12, 4  ;;  %v2218_v19 = vpop.f32.mrb[27].mxu1 }
0x1d16   :  { %v2224_v9 = vrot.slane %v2218_v19, 4 }
0x1d17   :  { %v2227_v23 = vadd.f32 %v2223_v20, %v3950_v52 }
0x1d18   :  { %v2228_v21 = vadd.f32 %v2224_v9, %v3958_v24 }
0x1d19   :  { %v2603_v13 = vmul.f32 -1.442695, %v2227_v23 }
0x1d1a   :  { %v2604_v52 = vmul.f32 -1.442695, %v2228_v21 }
0x1d1b   :  { %3256 = vpow2.f32 %v2603_v13 }
0x1d1c   :  { %3258 = vtanh.f32 %v2228_v21 }
0x1d24   :  { %v4071_v15 = vpop.f32.mrb[28].mxu1 }
0x1d25   :  { %v3257_v39 = vpop.eup %3256  ;;  %v2700_v25 = vpop.f32.mrb[29].mxu1 }
0x1d26   :  { %v2235_v16 = vadd.f32 1.0, %v3257_v39  ;;  %v3259_v26 = vpop.eup %3258 }
0x1d28   :  { %3260 = vrcp.f32 %v2235_v16 }
0x1d29   :  { %3262 = vpow2.f32 %v2604_v52 }
0x1d32   :  { %v3261_v50 = vpop.eup %3260 }
0x1d33   :  { %v2246_v27 = vmul.f32 %v3261_v50, %v3259_v26  ;;  %v2245_v1 = vmul.f32 %v3261_v50, %v2243_v56  ;;  %v3263_v28 = vpop.eup %3262 }
0x1d34   :  { %v2236_v4 = vadd.f32 1.0, %v3263_v28 }
0x1d35   :  { %2248 = vrot.lane.b32.xlu1 %v2246_v27, %s3307_s4 }
0x1d36   :  { %3264 = vrcp.f32 %v2236_v4 }
0x1d40   :  { %v3265_v31 = vpop.eup %3264 }
0x1da7   :  { %v2249_v29 = vpop.permute.xlu1 %2248 }
0x1da8   :  { %v2251_v24 = vadd.f32 %v2249_v29, %v2245_v1 }
0x1daa   :  { %3266 = vtanh.f32 %v2251_v24  ;;  %v2353_v43 = vrot.slane %v2251_v24, 6 }
0x1db4   :  { %v3267_v55 = vpop.eup %3266 }
0x1db5   :  { %v2253_v32 = vmul.f32 %v3267_v55, %v3265_v31 }
0x1db7   :  { %v2255_v35 = vrot.slane %v2253_v32, 4 }
0x1db9   :  { %2256 = vrot.lane.b32.xlu0 %v2255_v35, %s3307_s4 }
0x1e2b   :  { %v2257_v22 = vpop.permute.xlu0 %2256 }
0x1e2c   :  { %2605 = vmatmul.mubr.msk.f32.vlgmr.msra.gmra.mrb[20].mxu0 %vm385_vm3, %v2257_v22 }
0x1e2d   :  { %2717 = vmatprep.mubr.msk.f32.mxu0 %vm3309_vm7, %v3306_v47  ;;  %v2364_v47 = vld [vmem:[%s4136_s10] sm:$0xff] }
0x1eff   :  { %v2326_v40 = vpop.f32.mrb[20].mxu0 }
0x1f00   :  { %v2333_v18 = vrot.slane %v2326_v40, 2  ;;  %v2328_v59 = vpop.f32.mrb[21].mxu0 }
0x1f01   :  { %v2334_v42 = vrot.slane %v2328_v59, 2 }
0x1f02   :  { %v2337_v36 = vadd.f32 %v2333_v18, %v3944_v14  ;;  %v2365_v14 = vld [vmem:[%s4136_s10 + $0x8] sm:$0xff] }
0x1f03   :  { %v2338_v7 = vadd.f32 %v2334_v42, %v3952_v17  ;;  %v2366_v17 = vld [vmem:[%s4136_s10 + $0x10] sm:$0xff]  ;;  %v3069_v46 = vpack.c.bf16 %v2365_v14, %v2364_v47 }
0x1f04   :  { %v2606_v62 = vmul.f32 -1.442695, %v2337_v36  ;;  %v3072_v49 = vpack.c.bf16 %v2367_v48, %v2366_v17 }
0x1f05   :  { %3070 = vmatpush3.bf16.msra.mxu0 %v3069_v46  ;;  %v2607_v38 = vmul.f32 -1.442695, %v2338_v7 }
0x1f06   :  { %3268 = vpow2.f32 %v2606_v62  ;;  %3071 = vmatprep.subr.bf16.mxu0 %v3308_v45 }
0x1f07   :  { %3270 = vtanh.f32 %v2338_v7 }
0x1f09   :  { %3073 = vmatpush3.bf16.msra.mxu0 %v3072_v49 }
0x1f0a   :  { %3074 = vmatprep.subr.bf16.mxu0 %v3308_v45 }
0x1f0d   :  { %3076 = vmatpush3.bf16.msra.mxu0 %v3075_v60 }
0x1f0e   :  { %3077 = vmatprep.subr.bf16.mxu0 %v3308_v45  ;;  %v2610_v45 = vld [vmem:[%s4138_s12] ss:$0 sm:$0xff] }
0x1f10   :  { %v3269_v30 = vpop.eup %3268 }
0x1f11   :  { %v2345_v33 = vadd.f32 1.0, %v3269_v30  ;;  %v3271_v57 = vpop.eup %3270  ;;  %3079 = vmatpush3.bf16.msra.mxu0 %v3078_v0 }
0x1f13   :  { %3272 = vrcp.f32 %v2345_v33 }
0x1f14   :  { %3274 = vpow2.f32 %v2607_v38 }
0x1f1d   :  { %v3273_v51 = vpop.eup %3272 }
0x1f1e   :  { %v2356_v44 = vmul.f32 %v3273_v51, %v3271_v57  ;;  %v2355_v54 = vmul.f32 %v3273_v51, %v2353_v43  ;;  %v3275_v53 = vpop.eup %3274 }
0x1f1f   :  { %v2346_v2 = vadd.f32 1.0, %v3275_v53 }
0x1f20   :  { %2358 = vrot.lane.b32.xlu1 %v2356_v44, %s3307_s4 }
0x1f21   :  { %3276 = vrcp.f32 %v2346_v2 }
0x1f2b   :  { %v3277_v3 = vpop.eup %3276 }
0x1f92   :  { %v2359_v11 = vpop.permute.xlu1 %2358 }
0x1f93   :  { %v2361_v41 = vadd.f32 %v2359_v11, %v2355_v54 }
0x1f95   :  { %3278 = vtanh.f32 %v2361_v41 }
0x1f9f   :  { %v3279_v37 = vpop.eup %3278 }
0x1fa0   :  { %v2363_v5 = vmul.f32 %v3279_v37, %v3277_v3 }
0x1fa2   :  { %v2451_v6 = vrot.slane %v2363_v5, 6 }
0x1fa4   :  { %2452 = vrot.lane.b32.xlu0 %v2451_v6, %s3307_s4 }
0x2016   :  { %v2453_v8 = vpop.permute.xlu0 %2452 }
0x2017   :  { %2718 = vmatmul.mubr.msk.f32.vlgmr.msra.gmra.mrb[22].mxu0 %vm385_vm3, %v2453_v8 }
0x20ea   :  { %v2522_v10 = vpop.f32.mrb[22].mxu0 }
0x20eb   :  { %v2523_v12 = vadd.f32 %v2522_v10, %v4071_v15  ;;  %v2719_v20 = vpop.f32.mrb[23].mxu0 }
0x20ed   :  { %v2533_v19 = vadd.f32 %v2610_v45, %v2523_v12 }
0x20ef   :  { %2535 = vst.msk [vmem:[#allocation2] sm:$0x3] %vm2534_vm8, %v2533_v19 }
0x20f0   :  { %3291 = shalt.err (!%p3288_p4)
}
0x20f1   :  { %s3292_s12 = scalar_lea.hbm %s4139_s13, 32 }
0x20f2   :  { %p3293_p5 = scmp.ne.s32.totalorder %s4139_s13, %s3292_s12  ;;  %p3296_p6 = scmp.lt.u32.totalorder %s3292_s12, %s4139_s13 }
0x20f4   :  { %p3298_p7 = pnand %p3296_p6, %p3293_p5 }
0x20f6   :  { %3301 = shalt.err (!%p3298_p7)
}
0x20f7   :  { %2545 = dma.vmem_to_hbm [thread:$0]  %s2543_s21, 32, %s4139_s13, [#allocation3]  }
0x20f8   :  { %3302 = dma.done.wait [#allocation3], 32  }
0x20f9   :  { %3303 = vsyncadd [#allocation3], 4294967264 }
0x20fa   :  { %2549 = vsyncpa [#allocation3], 1 }

</bundles_post_ra>
